<compile_context>
chip_gen: v6e
topology: v6e:2x2x1
jax: 0.10.0
libtpu: 0.0.40
codegen_flags: <defaults>
</compile_context>

<pallas_src>
import jax
import jax.numpy as jnp
from jax.experimental import pallas as pl
from jax.experimental.pallas import tpu as pltpu

# ---- configuration (mirrors SepConvMixture(op=SepConv(C,C,5,stride=1,pad=2),
#                                            kernel_size_list=[3,5], kernel_max=5)) ----
N, H, W = 2, 16, 16
C_IN, C_OUT = 8, 8               # C_OUT == C_IN so the folded lane width stays 128
KERNEL_LIST = [3, 5]
KERNEL_MAX = 5
PAD = 2                          # get_padding(max(kernel_list)) == get_padding(5) == 2
BN_EPS = 1e-5                    # PyTorch BatchNorm2d default
WC_IN = W * C_IN                 # 128 lanes
WC_OUT = W * C_OUT               # 128 lanes


def sepconv_mixture_kernel(x_ref, m1_ref, g1_ref, be1_ref,
                           m2_ref, g2_ref, be2_ref,
                           o_ref, pad_ref):
    n, h, wc = x_ref.shape
    k = KERNEL_MAX
    p = PAD
    c = C_IN
    w = wc // c
    inv_count = 1.0 / float(n * h * w)       # BN per-channel count = N*H*W

    # Zero only the H-halo rows of the padded scratch, once. Both stages reuse the
    # scratch and only rewrite the interior rows.
    pad_ref[:, 0:p, :] = jnp.zeros((n, p, wc), jnp.float32)
    pad_ref[:, p + h:p + h + p, :] = jnp.zeros((n, p, wc), jnp.float32)

    def stage(x, mats_ref, g_ref, be_ref, relu):
        # Fused (depthwise conv -> 1x1 conv) as 5 lane-dense MXU matmuls, one per dy:
        # rows(dy) are the H-shifted sublane slices of the zero-halo padded activation.
        pad_ref[:, p:p + h, :] = x
        padded = pad_ref[...]                                       # (n, h+2p, wc)
        acc = jnp.zeros((n * h, wc), jnp.float32)
        for dy in range(k):
            rows = padded[:, dy:dy + h, :].reshape(n * h, wc)       # (n*h, wc)
            acc = acc + jnp.dot(rows, mats_ref[dy],
                                preferred_element_type=jnp.float32)

        # Single-pass BatchNorm batch statistics (training mode, biased variance):
        # sublane reduce, then period-C wraparound lane tree-reduce (direction-agnostic).
        # After the tree every lane l holds the stat of channel (l % C), i.e. the stats
        # are already broadcast for normalization.
        s1 = jnp.sum(acc, axis=0, keepdims=True)                    # (1, wc) sum
        s2 = jnp.sum(acc * acc, axis=0, keepdims=True)              # (1, wc) sum of squares
        st = jnp.concatenate([s1, s2], axis=0)                      # (2, wc)
        sft = c
        while sft < wc:                                             # W is a power of two
            st = st + pltpu.roll(st, sft, axis=1)
            sft *= 2
        mean = st[0:1, :] * inv_count
        ex2 = st[1:2, :] * inv_count
        var = ex2 - mean * mean
        scale = jax.lax.rsqrt(var + BN_EPS) * g_ref[...]
        out = (acc - mean) * scale + be_ref[...]
        if relu:
            out = jnp.maximum(out, 0.0)
        return out

    xin = jnp.maximum(x_ref[...], 0.0)                              # op[0] ReLU
    h1 = stage(xin, m1_ref, g1_ref, be1_ref, relu=True)             # op[1..4]
    h2 = stage(h1.reshape(n, h, wc), m2_ref, g2_ref, be2_ref,       # op[5..7]
               relu=False)
    o_ref[...] = h2.reshape(n, h, wc)


# ---------------- wrapper-side parameter glue (tiny XLA math, outside the kernel) ------

def mix_depthwise_weight(raw_w, alphas):
    """Alpha-weighted mixture of center-cropped kernels, zero padded back to Kmax.

    raw_w: PyTorch depthwise layout (C, 1, Kmax, Kmax).  Returns (C, Kmax, Kmax)."""
    c = raw_w.shape[0]
    mixed = jnp.zeros((c, KERNEL_MAX, KERNEL_MAX), jnp.float32)
    for i, ks in enumerate(KERNEL_LIST):
        start = (KERNEL_MAX - ks) // 2
        end = start + ks
        wcrop = raw_w[:, 0, start:end, start:end]
        wcrop = jnp.pad(wcrop, ((0, 0), (start, start), (start, start)))
        mixed = mixed + alphas[i] * wcrop
    return mixed


def fused_stage_matrices(mixed, pw_t):
    """Build the K fused (W*C_in, W*C_out) matrices B_dy = S_dy @ kron(I_W, pw).

    mixed: (C, K, K) mixed depthwise weight.  pw_t: PyTorch (C_out, C_in, 1, 1) 1x1 weight.
    S_dy is the banded per-channel depthwise tap matrix along the folded lane axis:
      S_dy[w_in*C+ci, w_out*C+co] = mixed[ci, dy, w_in - w_out + PAD]  if ci==co and
                                     0 <= w_in - w_out + PAD < K, else 0.
    Out-of-range w never appears as a lane, so edge zero-padding is implicit."""
    lane = jnp.arange(WC_IN)
    w_idx = lane // C_IN
    c_idx = lane % C_IN
    dx = w_idx[:, None] - w_idx[None, :] + PAD                      # w_in - w_out + PAD
    valid = (c_idx[:, None] == c_idx[None, :]) & (dx >= 0) & (dx < KERNEL_MAX)
    dxc = jnp.clip(dx, 0, KERNEL_MAX - 1)
    pw = jnp.transpose(pw_t[:, :, 0, 0], (1, 0)).astype(jnp.float32)   # (C_in, C_out)
    mpw = jnp.kron(jnp.eye(W, dtype=jnp.float32), pw)                  # (WC_IN, WC_OUT)
    mats = []
    for dy in range(KERNEL_MAX):
        s_dy = jnp.where(valid, mixed[c_idx[:, None], dy, dxc], 0.0)   # (WC_IN, WC_IN)
        mats.append(jnp.dot(s_dy, mpw, precision=jax.lax.Precision.HIGHEST))
    return jnp.stack(mats, axis=0)                                     # (K, WC_IN, WC_OUT)


def tile_channel(v, c):
    """Per-channel (.., c) vector -> (1, W*c) lane-dense tile (pattern c repeats W times)."""
    return jnp.tile(v.reshape(-1).astype(jnp.float32), (W,)).reshape(1, W * c)


@jax.jit
def sepconv_mixture_forward(x_nchw, alphas, dw1, pw1_t, g1, b1, dw2, pw2_t, g2, b2):
    # NCHW -> NHWC -> fold (W, C) onto the 128-lane axis.
    x = jnp.transpose(x_nchw, (0, 2, 3, 1)).astype(jnp.float32).reshape(N, H, WC_IN)
    m1 = fused_stage_matrices(mix_depthwise_weight(dw1, alphas), pw1_t)  # (5, 128, 128)
    m2 = fused_stage_matrices(mix_depthwise_weight(dw2, alphas), pw2_t)  # (5, 128, 128)
    g1t, b1t = tile_channel(g1, C_IN), tile_channel(b1, C_IN)            # (1, 128)
    g2t, b2t = tile_channel(g2, C_OUT), tile_channel(b2, C_OUT)

    out = pl.pallas_call(
        sepconv_mixture_kernel,
        out_shape=jax.ShapeDtypeStruct((N, H, WC_OUT), jnp.float32),
        grid=(1,),
        in_specs=[
            pl.BlockSpec((N, H, WC_IN), lambda i: (0, 0, 0)),
            pl.BlockSpec((KERNEL_MAX, WC_IN, WC_OUT), lambda i: (0, 0, 0)),
            pl.BlockSpec((1, WC_IN), lambda i: (0, 0)),
            pl.BlockSpec((1, WC_IN), lambda i: (0, 0)),
            pl.BlockSpec((KERNEL_MAX, WC_IN, WC_OUT), lambda i: (0, 0, 0)),
            pl.BlockSpec((1, WC_OUT), lambda i: (0, 0)),
            pl.BlockSpec((1, WC_OUT), lambda i: (0, 0)),
        ],
        out_specs=pl.BlockSpec((N, H, WC_OUT), lambda i: (0, 0, 0)),
        scratch_shapes=[pltpu.VMEM((N, H + 2 * PAD, WC_IN), jnp.float32)],
        compiler_params=pltpu.CompilerParams(dimension_semantics=("arbitrary",)),
    )(x, m1, g1t, b1t, m2, g2t, b2t)

    out = out.reshape(N, H, W, C_OUT)
    return jnp.transpose(out, (0, 3, 1, 2))                        # NHWC -> NCHW


# ---------------- pure-JAX reference (for correctness check only) ----------------------

def reference_forward(x_nchw, alphas, dw1, pw1_t, g1, b1, dw2, pw2_t, g2, b2):
    hp = jax.lax.Precision.HIGHEST

    def depthwise(x, w):
        return jax.lax.conv_general_dilated(
            x, w[:, None, :, :], window_strides=(1, 1),
            padding=((PAD, PAD), (PAD, PAD)),
            dimension_numbers=("NCHW", "OIHW", "NCHW"),
            feature_group_count=C_IN, precision=hp)

    def pointwise(x, w):
        return jax.lax.conv_general_dilated(
            x, w, window_strides=(1, 1), padding="VALID",
            dimension_numbers=("NCHW", "OIHW", "NCHW"), precision=hp)

    def bn(x, g, b):
        mean = jnp.mean(x, axis=(0, 2, 3), keepdims=True)
        var = jnp.mean(jnp.square(x - mean), axis=(0, 2, 3), keepdims=True)
        xn = (x - mean) * jax.lax.rsqrt(var + BN_EPS)
        return xn * g.reshape(1, -1, 1, 1) + b.reshape(1, -1, 1, 1)

    x = jnp.maximum(x_nchw, 0.0)
    x = depthwise(x, mix_depthwise_weight(dw1, alphas))
    x = pointwise(x, pw1_t)
    x = bn(x, g1, b1)
    x = jnp.maximum(x, 0.0)
    x = depthwise(x, mix_depthwise_weight(dw2, alphas))
    x = pointwise(x, pw2_t)
    x = bn(x, g2, b2)
    return x


if __name__ == "__main__":
    key = jax.random.PRNGKey(0)
    ks = jax.random.split(key, 10)

    # input (NCHW like PyTorch) and architecture weights (alphas over kernel sizes)
    x_nchw = jax.random.normal(ks[0], (N, C_IN, H, W), jnp.float32)
    alphas = jax.nn.softmax(jax.random.normal(ks[1], (len(KERNEL_LIST),), jnp.float32))

    # op[1], op[5]: depthwise 5x5 weights, PyTorch layout (C, 1, Kmax, Kmax), bias=False
    dw1 = 0.1 * jax.random.normal(ks[2], (C_IN, 1, KERNEL_MAX, KERNEL_MAX), jnp.float32)
    dw2 = 0.1 * jax.random.normal(ks[3], (C_IN, 1, KERNEL_MAX, KERNEL_MAX), jnp.float32)
    # op[2], op[6]: pointwise 1x1 weights, PyTorch layout (C_out, C_in, 1, 1), bias=False
    pw1_t = 0.1 * jax.random.normal(ks[4], (C_IN, C_IN, 1, 1), jnp.float32)
    pw2_t = 0.1 * jax.random.normal(ks[5], (C_OUT, C_IN, 1, 1), jnp.float32)
    # op[3], op[7]: BatchNorm affine params (gamma, beta)
    g1 = 1.0 + 0.05 * jax.random.normal(ks[6], (1, C_IN), jnp.float32)
    b1 = 0.05 * jax.random.normal(ks[7], (1, C_IN), jnp.float32)
    g2 = 1.0 + 0.05 * jax.random.normal(ks[8], (1, C_OUT), jnp.float32)
    b2 = 0.05 * jax.random.normal(ks[9], (1, C_OUT), jnp.float32)

    out = sepconv_mixture_forward(x_nchw, alphas, dw1, pw1_t, g1, b1, dw2, pw2_t, g2, b2)
    jax.block_until_ready(out)
    assert out.shape == (N, C_OUT, H, W)

    ref = reference_forward(x_nchw, alphas, dw1, pw1_t, g1, b1, dw2, pw2_t, g2, b2)
    jax.block_until_ready(ref)
    max_err = float(jnp.max(jnp.abs(out - ref)))
    assert max_err < 5e-2, f"kernel/reference mismatch: max abs err = {max_err}"

    print("KERNEL_OK")
</pallas_src>

<mosaic_0001>
module attributes {stable_mosaic.version = 11 : i64} {
  func.func @sepconv_mixture_kernel(%arg0: i32, %arg1: memref<2x16x128xf32, #tpu.memory_space<vmem>>, %arg2: memref<5x128x128xf32, #tpu.memory_space<vmem>>, %arg3: memref<1x128xf32, #tpu.memory_space<vmem>>, %arg4: memref<1x128xf32, #tpu.memory_space<vmem>>, %arg5: memref<5x128x128xf32, #tpu.memory_space<vmem>>, %arg6: memref<1x128xf32, #tpu.memory_space<vmem>>, %arg7: memref<1x128xf32, #tpu.memory_space<vmem>>, %arg8: memref<2x16x128xf32, #tpu.memory_space<vmem>>, %arg9: memref<2x20x128xf32, #tpu.memory_space<vmem>>) attributes {dimension_semantics = [#tpu.dimension_semantics<arbitrary>], iteration_bounds = array<i64: 1>, scalar_prefetch = 0 : i64, scratch_operands = 1 : i64, tpu.core_type = #tpu.core_type<tc>, window_params = [{pipeline_mode = #tpu.pipeline_mode<synchronous>, transform_indices = @transform_0, window_bounds = array<i64: 2, 16, 128>}, {pipeline_mode = #tpu.pipeline_mode<synchronous>, transform_indices = @transform_1, window_bounds = array<i64: 5, 128, 128>}, {pipeline_mode = #tpu.pipeline_mode<synchronous>, transform_indices = @transform_2, window_bounds = array<i64: 1, 128>}, {pipeline_mode = #tpu.pipeline_mode<synchronous>, transform_indices = @transform_3, window_bounds = array<i64: 1, 128>}, {pipeline_mode = #tpu.pipeline_mode<synchronous>, transform_indices = @transform_4, window_bounds = array<i64: 5, 128, 128>}, {pipeline_mode = #tpu.pipeline_mode<synchronous>, transform_indices = @transform_5, window_bounds = array<i64: 1, 128>}, {pipeline_mode = #tpu.pipeline_mode<synchronous>, transform_indices = @transform_6, window_bounds = array<i64: 1, 128>}, {pipeline_mode = #tpu.pipeline_mode<synchronous>, transform_indices = @transform_7, window_bounds = array<i64: 2, 16, 128>}]} {
    %cst = arith.constant 0.000000e+00 : f32
    %0 = vector.broadcast %cst : f32 to vector<2x2x128xf32>
    %c0 = arith.constant 0 : index
    %c0_0 = arith.constant 0 : index
    %c0_1 = arith.constant 0 : index
    %1 = vector.load %arg9[%c0, %c0_0, %c0_1] : memref<2x20x128xf32, #tpu.memory_space<vmem>>, vector<2x2x128xf32>
    tpu.vector_store %arg9[%c0, %c0_0, %c0_1], %0 {strides = array<i32>} : memref<2x20x128xf32, #tpu.memory_space<vmem>>, vector<2x2x128xf32>,
    %cst_2 = arith.constant 0.000000e+00 : f32
    %2 = vector.broadcast %cst_2 : f32 to vector<2x2x128xf32>
    %c0_3 = arith.constant 0 : index
    %c18 = arith.constant 18 : index
    %c0_4 = arith.constant 0 : index
    %3 = vector.load %arg9[%c0_3, %c18, %c0_4] : memref<2x20x128xf32, #tpu.memory_space<vmem>>, vector<2x2x128xf32>
    tpu.vector_store %arg9[%c0_3, %c18, %c0_4], %2 {strides = array<i32>} : memref<2x20x128xf32, #tpu.memory_space<vmem>>, vector<2x2x128xf32>,
    %c0_5 = arith.constant 0 : index
    %c0_6 = arith.constant 0 : index
    %c0_7 = arith.constant 0 : index
    %4 = vector.load %arg1[%c0_5, %c0_6, %c0_7] : memref<2x16x128xf32, #tpu.memory_space<vmem>>, vector<2x16x128xf32>
    %cst_8 = arith.constant 0.000000e+00 : f32
    %5 = vector.broadcast %cst_8 : f32 to vector<2x16x128xf32>
    %6 = arith.maximumf %4, %5 : vector<2x16x128xf32>
    %c0_9 = arith.constant 0 : index
    %c2 = arith.constant 2 : index
    %c0_10 = arith.constant 0 : index
    %7 = vector.load %arg9[%c0_9, %c2, %c0_10] : memref<2x20x128xf32, #tpu.memory_space<vmem>>, vector<2x16x128xf32>
    tpu.vector_store %arg9[%c0_9, %c2, %c0_10], %6 {strides = array<i32>} : memref<2x20x128xf32, #tpu.memory_space<vmem>>, vector<2x16x128xf32>,
    %c0_11 = arith.constant 0 : index
    %c0_12 = arith.constant 0 : index
    %c0_13 = arith.constant 0 : index
    %8 = vector.load %arg9[%c0_11, %c0_12, %c0_13] : memref<2x20x128xf32, #tpu.memory_space<vmem>>, vector<2x20x128xf32>
    %cst_14 = arith.constant 0.000000e+00 : f32
    %9 = vector.broadcast %cst_14 : f32 to vector<32x128xf32>
    %10 = vector.extract_strided_slice %8 {offsets = [0, 0, 0], sizes = [2, 16, 128], strides = [1, 1, 1]} : vector<2x20x128xf32> to vector<2x16x128xf32>
    %11 = vector.shape_cast %10 : vector<2x16x128xf32> to vector<32x128xf32>
    %c0_15 = arith.constant 0 : index
    %c0_16 = arith.constant 0 : index
    %c0_17 = arith.constant 0 : index
    %12 = vector.load %arg2[%c0_15, %c0_16, %c0_17] : memref<5x128x128xf32, #tpu.memory_space<vmem>>, vector<1x128x128xf32>
    %13 = vector.shape_cast %12 : vector<1x128x128xf32> to vector<128x128xf32>
    %cst_18 = arith.constant dense<0.000000e+00> : vector<32x128xf32>
    %14 = tpu.matmul %11, %13, %cst_18 {dimension_numbers = #tpu.dot_dimension_numbers<[1], [0], [0], [1], [0, 0, 1, 1], [], []>} : vector<32x128xf32>, vector<128x128xf32>, vector<32x128xf32> -> vector<32x128xf32>
    %15 = arith.addf %9, %14 : vector<32x128xf32>
    %16 = vector.extract_strided_slice %8 {offsets = [0, 1, 0], sizes = [2, 16, 128], strides = [1, 1, 1]} : vector<2x20x128xf32> to vector<2x16x128xf32>
    %17 = vector.shape_cast %16 : vector<2x16x128xf32> to vector<32x128xf32>
    %c1 = arith.constant 1 : index
    %c0_19 = arith.constant 0 : index
    %c0_20 = arith.constant 0 : index
    %18 = vector.load %arg2[%c1, %c0_19, %c0_20] : memref<5x128x128xf32, #tpu.memory_space<vmem>>, vector<1x128x128xf32>
    %19 = vector.shape_cast %18 : vector<1x128x128xf32> to vector<128x128xf32>
    %cst_21 = arith.constant dense<0.000000e+00> : vector<32x128xf32>
    %20 = tpu.matmul %17, %19, %cst_21 {dimension_numbers = #tpu.dot_dimension_numbers<[1], [0], [0], [1], [0, 0, 1, 1], [], []>} : vector<32x128xf32>, vector<128x128xf32>, vector<32x128xf32> -> vector<32x128xf32>
    %21 = arith.addf %15, %20 : vector<32x128xf32>
    %22 = vector.extract_strided_slice %8 {offsets = [0, 2, 0], sizes = [2, 16, 128], strides = [1, 1, 1]} : vector<2x20x128xf32> to vector<2x16x128xf32>
    %23 = vector.shape_cast %22 : vector<2x16x128xf32> to vector<32x128xf32>
    %c2_22 = arith.constant 2 : index
    %c0_23 = arith.constant 0 : index
    %c0_24 = arith.constant 0 : index
    %24 = vector.load %arg2[%c2_22, %c0_23, %c0_24] : memref<5x128x128xf32, #tpu.memory_space<vmem>>, vector<1x128x128xf32>
    %25 = vector.shape_cast %24 : vector<1x128x128xf32> to vector<128x128xf32>
    %cst_25 = arith.constant dense<0.000000e+00> : vector<32x128xf32>
    %26 = tpu.matmul %23, %25, %cst_25 {dimension_numbers = #tpu.dot_dimension_numbers<[1], [0], [0], [1], [0, 0, 1, 1], [], []>} : vector<32x128xf32>, vector<128x128xf32>, vector<32x128xf32> -> vector<32x128xf32>
    %27 = arith.addf %21, %26 : vector<32x128xf32>
    %28 = vector.extract_strided_slice %8 {offsets = [0, 3, 0], sizes = [2, 16, 128], strides = [1, 1, 1]} : vector<2x20x128xf32> to vector<2x16x128xf32>
    %29 = vector.shape_cast %28 : vector<2x16x128xf32> to vector<32x128xf32>
    %c3 = arith.constant 3 : index
    %c0_26 = arith.constant 0 : index
    %c0_27 = arith.constant 0 : index
    %30 = vector.load %arg2[%c3, %c0_26, %c0_27] : memref<5x128x128xf32, #tpu.memory_space<vmem>>, vector<1x128x128xf32>
    %31 = vector.shape_cast %30 : vector<1x128x128xf32> to vector<128x128xf32>
    %cst_28 = arith.constant dense<0.000000e+00> : vector<32x128xf32>
    %32 = tpu.matmul %29, %31, %cst_28 {dimension_numbers = #tpu.dot_dimension_numbers<[1], [0], [0], [1], [0, 0, 1, 1], [], []>} : vector<32x128xf32>, vector<128x128xf32>, vector<32x128xf32> -> vector<32x128xf32>
    %33 = arith.addf %27, %32 : vector<32x128xf32>
    %34 = vector.extract_strided_slice %8 {offsets = [0, 4, 0], sizes = [2, 16, 128], strides = [1, 1, 1]} : vector<2x20x128xf32> to vector<2x16x128xf32>
    %35 = vector.shape_cast %34 : vector<2x16x128xf32> to vector<32x128xf32>
    %c4 = arith.constant 4 : index
    %c0_29 = arith.constant 0 : index
    %c0_30 = arith.constant 0 : index
    %36 = vector.load %arg2[%c4, %c0_29, %c0_30] : memref<5x128x128xf32, #tpu.memory_space<vmem>>, vector<1x128x128xf32>
    %37 = vector.shape_cast %36 : vector<1x128x128xf32> to vector<128x128xf32>
    %cst_31 = arith.constant dense<0.000000e+00> : vector<32x128xf32>
    %38 = tpu.matmul %35, %37, %cst_31 {dimension_numbers = #tpu.dot_dimension_numbers<[1], [0], [0], [1], [0, 0, 1, 1], [], []>} : vector<32x128xf32>, vector<128x128xf32>, vector<32x128xf32> -> vector<32x128xf32>
    %39 = arith.addf %33, %38 : vector<32x128xf32>
    %cst_32 = arith.constant dense<0.000000e+00> : vector<128xf32>
    %40 = vector.multi_reduction <add>, %39, %cst_32 [0] : vector<32x128xf32> to vector<128xf32>
    %41 = vector.shape_cast %40 : vector<128xf32> to vector<1x128xf32>
    %42 = arith.mulf %39, %39 : vector<32x128xf32>
    %cst_33 = arith.constant dense<0.000000e+00> : vector<128xf32>
    %43 = vector.multi_reduction <add>, %42, %cst_33 [0] : vector<32x128xf32> to vector<128xf32>
    %44 = vector.shape_cast %43 : vector<128xf32> to vector<1x128xf32>
    %45 = tpu.concatenate %41, %44 in 0 : vector<1x128xf32>, vector<1x128xf32> -> vector<2x128xf32>
    %c8_i32 = arith.constant 8 : i32
    %46 = tpu.dynamic_rotate %45 by %c8_i32 dim 1 : vector<2x128xf32>, i32 -> vector<2x128xf32>
    %47 = arith.addf %45, %46 : vector<2x128xf32>
    %c16_i32 = arith.constant 16 : i32
    %48 = tpu.dynamic_rotate %47 by %c16_i32 dim 1 : vector<2x128xf32>, i32 -> vector<2x128xf32>
    %49 = arith.addf %47, %48 : vector<2x128xf32>
    %c32_i32 = arith.constant 32 : i32
    %50 = tpu.dynamic_rotate %49 by %c32_i32 dim 1 : vector<2x128xf32>, i32 -> vector<2x128xf32>
    %51 = arith.addf %49, %50 : vector<2x128xf32>
    %c64_i32 = arith.constant 64 : i32
    %52 = tpu.dynamic_rotate %51 by %c64_i32 dim 1 : vector<2x128xf32>, i32 -> vector<2x128xf32>
    %53 = arith.addf %51, %52 : vector<2x128xf32>
    %54 = vector.extract_strided_slice %53 {offsets = [0, 0], sizes = [1, 128], strides = [1, 1]} : vector<2x128xf32> to vector<1x128xf32>
    %cst_34 = arith.constant 0.001953125 : f32
    %55 = vector.broadcast %cst_34 : f32 to vector<1x128xf32>
    %56 = arith.mulf %54, %55 : vector<1x128xf32>
    %57 = vector.extract_strided_slice %53 {offsets = [1, 0], sizes = [1, 128], strides = [1, 1]} : vector<2x128xf32> to vector<1x128xf32>
    %cst_35 = arith.constant 0.001953125 : f32
    %58 = vector.broadcast %cst_35 : f32 to vector<1x128xf32>
    %59 = arith.mulf %57, %58 : vector<1x128xf32>
    %60 = arith.mulf %56, %56 : vector<1x128xf32>
    %61 = arith.subf %59, %60 : vector<1x128xf32>
    %cst_36 = arith.constant 9.99999974E-6 : f32
    %62 = vector.broadcast %cst_36 : f32 to vector<1x128xf32>
    %63 = arith.addf %61, %62 : vector<1x128xf32>
    %64 = math.rsqrt %63 : vector<1x128xf32>
    %c0_37 = arith.constant 0 : index
    %c0_38 = arith.constant 0 : index
    %65 = vector.load %arg3[%c0_37, %c0_38] : memref<1x128xf32, #tpu.memory_space<vmem>>, vector<1x128xf32>
    %66 = arith.mulf %64, %65 : vector<1x128xf32>
    %67 = vector.broadcast %56 : vector<1x128xf32> to vector<32x128xf32>
    %68 = arith.subf %39, %67 : vector<32x128xf32>
    %69 = vector.broadcast %66 : vector<1x128xf32> to vector<32x128xf32>
    %70 = arith.mulf %68, %69 : vector<32x128xf32>
    %c0_39 = arith.constant 0 : index
    %c0_40 = arith.constant 0 : index
    %71 = vector.load %arg4[%c0_39, %c0_40] : memref<1x128xf32, #tpu.memory_space<vmem>>, vector<1x128xf32>
    %72 = vector.broadcast %71 : vector<1x128xf32> to vector<32x128xf32>
    %73 = arith.addf %70, %72 : vector<32x128xf32>
    %cst_41 = arith.constant 0.000000e+00 : f32
    %74 = vector.broadcast %cst_41 : f32 to vector<32x128xf32>
    %75 = arith.maximumf %73, %74 : vector<32x128xf32>
    %76 = vector.shape_cast %75 : vector<32x128xf32> to vector<2x16x128xf32>
    %c0_42 = arith.constant 0 : index
    %c2_43 = arith.constant 2 : index
    %c0_44 = arith.constant 0 : index
    %77 = vector.load %arg9[%c0_42, %c2_43, %c0_44] : memref<2x20x128xf32, #tpu.memory_space<vmem>>, vector<2x16x128xf32>
    tpu.vector_store %arg9[%c0_42, %c2_43, %c0_44], %76 {strides = array<i32>} : memref<2x20x128xf32, #tpu.memory_space<vmem>>, vector<2x16x128xf32>,
    %c0_45 = arith.constant 0 : index
    %c0_46 = arith.constant 0 : index
    %c0_47 = arith.constant 0 : index
    %78 = vector.load %arg9[%c0_45, %c0_46, %c0_47] : memref<2x20x128xf32, #tpu.memory_space<vmem>>, vector<2x20x128xf32>
    %cst_48 = arith.constant 0.000000e+00 : f32
    %79 = vector.broadcast %cst_48 : f32 to vector<32x128xf32>
    %80 = vector.extract_strided_slice %78 {offsets = [0, 0, 0], sizes = [2, 16, 128], strides = [1, 1, 1]} : vector<2x20x128xf32> to vector<2x16x128xf32>
    %81 = vector.shape_cast %80 : vector<2x16x128xf32> to vector<32x128xf32>
    %c0_49 = arith.constant 0 : index
    %c0_50 = arith.constant 0 : index
    %c0_51 = arith.constant 0 : index
    %82 = vector.load %arg5[%c0_49, %c0_50, %c0_51] : memref<5x128x128xf32, #tpu.memory_space<vmem>>, vector<1x128x128xf32>
    %83 = vector.shape_cast %82 : vector<1x128x128xf32> to vector<128x128xf32>
    %cst_52 = arith.constant dense<0.000000e+00> : vector<32x128xf32>
    %84 = tpu.matmul %81, %83, %cst_52 {dimension_numbers = #tpu.dot_dimension_numbers<[1], [0], [0], [1], [0, 0, 1, 1], [], []>} : vector<32x128xf32>, vector<128x128xf32>, vector<32x128xf32> -> vector<32x128xf32>
    %85 = arith.addf %79, %84 : vector<32x128xf32>
    %86 = vector.extract_strided_slice %78 {offsets = [0, 1, 0], sizes = [2, 16, 128], strides = [1, 1, 1]} : vector<2x20x128xf32> to vector<2x16x128xf32>
    %87 = vector.shape_cast %86 : vector<2x16x128xf32> to vector<32x128xf32>
    %c1_53 = arith.constant 1 : index
    %c0_54 = arith.constant 0 : index
    %c0_55 = arith.constant 0 : index
    %88 = vector.load %arg5[%c1_53, %c0_54, %c0_55] : memref<5x128x128xf32, #tpu.memory_space<vmem>>, vector<1x128x128xf32>
    %89 = vector.shape_cast %88 : vector<1x128x128xf32> to vector<128x128xf32>
    %cst_56 = arith.constant dense<0.000000e+00> : vector<32x128xf32>
    %90 = tpu.matmul %87, %89, %cst_56 {dimension_numbers = #tpu.dot_dimension_numbers<[1], [0], [0], [1], [0, 0, 1, 1], [], []>} : vector<32x128xf32>, vector<128x128xf32>, vector<32x128xf32> -> vector<32x128xf32>
    %91 = arith.addf %85, %90 : vector<32x128xf32>
    %92 = vector.extract_strided_slice %78 {offsets = [0, 2, 0], sizes = [2, 16, 128], strides = [1, 1, 1]} : vector<2x20x128xf32> to vector<2x16x128xf32>
    %93 = vector.shape_cast %92 : vector<2x16x128xf32> to vector<32x128xf32>
    %c2_57 = arith.constant 2 : index
    %c0_58 = arith.constant 0 : index
    %c0_59 = arith.constant 0 : index
    %94 = vector.load %arg5[%c2_57, %c0_58, %c0_59] : memref<5x128x128xf32, #tpu.memory_space<vmem>>, vector<1x128x128xf32>
    %95 = vector.shape_cast %94 : vector<1x128x128xf32> to vector<128x128xf32>
    %cst_60 = arith.constant dense<0.000000e+00> : vector<32x128xf32>
    %96 = tpu.matmul %93, %95, %cst_60 {dimension_numbers = #tpu.dot_dimension_numbers<[1], [0], [0], [1], [0, 0, 1, 1], [], []>} : vector<32x128xf32>, vector<128x128xf32>, vector<32x128xf32> -> vector<32x128xf32>
    %97 = arith.addf %91, %96 : vector<32x128xf32>
    %98 = vector.extract_strided_slice %78 {offsets = [0, 3, 0], sizes = [2, 16, 128], strides = [1, 1, 1]} : vector<2x20x128xf32> to vector<2x16x128xf32>
    %99 = vector.shape_cast %98 : vector<2x16x128xf32> to vector<32x128xf32>
    %c3_61 = arith.constant 3 : index
    %c0_62 = arith.constant 0 : index
    %c0_63 = arith.constant 0 : index
    %100 = vector.load %arg5[%c3_61, %c0_62, %c0_63] : memref<5x128x128xf32, #tpu.memory_space<vmem>>, vector<1x128x128xf32>
    %101 = vector.shape_cast %100 : vector<1x128x128xf32> to vector<128x128xf32>
    %cst_64 = arith.constant dense<0.000000e+00> : vector<32x128xf32>
    %102 = tpu.matmul %99, %101, %cst_64 {dimension_numbers = #tpu.dot_dimension_numbers<[1], [0], [0], [1], [0, 0, 1, 1], [], []>} : vector<32x128xf32>, vector<128x128xf32>, vector<32x128xf32> -> vector<32x128xf32>
    %103 = arith.addf %97, %102 : vector<32x128xf32>
    %104 = vector.extract_strided_slice %78 {offsets = [0, 4, 0], sizes = [2, 16, 128], strides = [1, 1, 1]} : vector<2x20x128xf32> to vector<2x16x128xf32>
    %105 = vector.shape_cast %104 : vector<2x16x128xf32> to vector<32x128xf32>
    %c4_65 = arith.constant 4 : index
    %c0_66 = arith.constant 0 : index
    %c0_67 = arith.constant 0 : index
    %106 = vector.load %arg5[%c4_65, %c0_66, %c0_67] : memref<5x128x128xf32, #tpu.memory_space<vmem>>, vector<1x128x128xf32>
    %107 = vector.shape_cast %106 : vector<1x128x128xf32> to vector<128x128xf32>
    %cst_68 = arith.constant dense<0.000000e+00> : vector<32x128xf32>
    %108 = tpu.matmul %105, %107, %cst_68 {dimension_numbers = #tpu.dot_dimension_numbers<[1], [0], [0], [1], [0, 0, 1, 1], [], []>} : vector<32x128xf32>, vector<128x128xf32>, vector<32x128xf32> -> vector<32x128xf32>
    %109 = arith.addf %103, %108 : vector<32x128xf32>
    %cst_69 = arith.constant dense<0.000000e+00> : vector<128xf32>
    %110 = vector.multi_reduction <add>, %109, %cst_69 [0] : vector<32x128xf32> to vector<128xf32>
    %111 = vector.shape_cast %110 : vector<128xf32> to vector<1x128xf32>
    %112 = arith.mulf %109, %109 : vector<32x128xf32>
    %cst_70 = arith.constant dense<0.000000e+00> : vector<128xf32>
    %113 = vector.multi_reduction <add>, %112, %cst_70 [0] : vector<32x128xf32> to vector<128xf32>
    %114 = vector.shape_cast %113 : vector<128xf32> to vector<1x128xf32>
    %115 = tpu.concatenate %111, %114 in 0 : vector<1x128xf32>, vector<1x128xf32> -> vector<2x128xf32>
    %c8_i32_71 = arith.constant 8 : i32
    %116 = tpu.dynamic_rotate %115 by %c8_i32_71 dim 1 : vector<2x128xf32>, i32 -> vector<2x128xf32>
    %117 = arith.addf %115, %116 : vector<2x128xf32>
    %c16_i32_72 = arith.constant 16 : i32
    %118 = tpu.dynamic_rotate %117 by %c16_i32_72 dim 1 : vector<2x128xf32>, i32 -> vector<2x128xf32>
    %119 = arith.addf %117, %118 : vector<2x128xf32>
    %c32_i32_73 = arith.constant 32 : i32
    %120 = tpu.dynamic_rotate %119 by %c32_i32_73 dim 1 : vector<2x128xf32>, i32 -> vector<2x128xf32>
    %121 = arith.addf %119, %120 : vector<2x128xf32>
    %c64_i32_74 = arith.constant 64 : i32
    %122 = tpu.dynamic_rotate %121 by %c64_i32_74 dim 1 : vector<2x128xf32>, i32 -> vector<2x128xf32>
    %123 = arith.addf %121, %122 : vector<2x128xf32>
    %124 = vector.extract_strided_slice %123 {offsets = [0, 0], sizes = [1, 128], strides = [1, 1]} : vector<2x128xf32> to vector<1x128xf32>
    %cst_75 = arith.constant 0.001953125 : f32
    %125 = vector.broadcast %cst_75 : f32 to vector<1x128xf32>
    %126 = arith.mulf %124, %125 : vector<1x128xf32>
    %127 = vector.extract_strided_slice %123 {offsets = [1, 0], sizes = [1, 128], strides = [1, 1]} : vector<2x128xf32> to vector<1x128xf32>
    %cst_76 = arith.constant 0.001953125 : f32
    %128 = vector.broadcast %cst_76 : f32 to vector<1x128xf32>
    %129 = arith.mulf %127, %128 : vector<1x128xf32>
    %130 = arith.mulf %126, %126 : vector<1x128xf32>
    %131 = arith.subf %129, %130 : vector<1x128xf32>
    %cst_77 = arith.constant 9.99999974E-6 : f32
    %132 = vector.broadcast %cst_77 : f32 to vector<1x128xf32>
    %133 = arith.addf %131, %132 : vector<1x128xf32>
    %134 = math.rsqrt %133 : vector<1x128xf32>
    %c0_78 = arith.constant 0 : index
    %c0_79 = arith.constant 0 : index
    %135 = vector.load %arg6[%c0_78, %c0_79] : memref<1x128xf32, #tpu.memory_space<vmem>>, vector<1x128xf32>
    %136 = arith.mulf %134, %135 : vector<1x128xf32>
    %137 = vector.broadcast %126 : vector<1x128xf32> to vector<32x128xf32>
    %138 = arith.subf %109, %137 : vector<32x128xf32>
    %139 = vector.broadcast %136 : vector<1x128xf32> to vector<32x128xf32>
    %140 = arith.mulf %138, %139 : vector<32x128xf32>
    %c0_80 = arith.constant 0 : index
    %c0_81 = arith.constant 0 : index
    %141 = vector.load %arg7[%c0_80, %c0_81] : memref<1x128xf32, #tpu.memory_space<vmem>>, vector<1x128xf32>
    %142 = vector.broadcast %141 : vector<1x128xf32> to vector<32x128xf32>
    %143 = arith.addf %140, %142 : vector<32x128xf32>
    %144 = vector.shape_cast %143 : vector<32x128xf32> to vector<2x16x128xf32>
    %c0_82 = arith.constant 0 : index
    %c0_83 = arith.constant 0 : index
    %c0_84 = arith.constant 0 : index
    %145 = vector.load %arg8[%c0_82, %c0_83, %c0_84] : memref<2x16x128xf32, #tpu.memory_space<vmem>>, vector<2x16x128xf32>
    tpu.vector_store %arg8[%c0_82, %c0_83, %c0_84], %144 {strides = array<i32>} : memref<2x16x128xf32, #tpu.memory_space<vmem>>, vector<2x16x128xf32>,
    return
  }
  func.func @transform_0(%arg0: i32) -> (i32, i32, i32) {
    %c0_i32 = arith.constant 0 : i32
    %c0_i32_0 = arith.constant 0 : i32
    %c0_i32_1 = arith.constant 0 : i32
    %c0_i32_2 = arith.constant 0 : i32
    return %c0_i32, %c0_i32_0, %c0_i32_1 : i32, i32, i32
  }
  func.func @transform_1(%arg0: i32) -> (i32, i32, i32) {
    %c0_i32 = arith.constant 0 : i32
    %c0_i32_0 = arith.constant 0 : i32
    %c0_i32_1 = arith.constant 0 : i32
    %c0_i32_2 = arith.constant 0 : i32
    return %c0_i32, %c0_i32_0, %c0_i32_1 : i32, i32, i32
  }
  func.func @transform_2(%arg0: i32) -> (i32, i32) {
    %c0_i32 = arith.constant 0 : i32
    %c0_i32_0 = arith.constant 0 : i32
    %c0_i32_1 = arith.constant 0 : i32
    return %c0_i32, %c0_i32_0 : i32, i32
  }
  func.func @transform_3(%arg0: i32) -> (i32, i32) {
    %c0_i32 = arith.constant 0 : i32
    %c0_i32_0 = arith.constant 0 : i32
    %c0_i32_1 = arith.constant 0 : i32
    return %c0_i32, %c0_i32_0 : i32, i32
  }
  func.func @transform_4(%arg0: i32) -> (i32, i32, i32) {
    %c0_i32 = arith.constant 0 : i32
    %c0_i32_0 = arith.constant 0 : i32
    %c0_i32_1 = arith.constant 0 : i32
    %c0_i32_2 = arith.constant 0 : i32
    return %c0_i32, %c0_i32_0, %c0_i32_1 : i32, i32, i32
  }
  func.func @transform_5(%arg0: i32) -> (i32, i32) {
    %c0_i32 = arith.constant 0 : i32
    %c0_i32_0 = arith.constant 0 : i32
    %c0_i32_1 = arith.constant 0 : i32
    return %c0_i32, %c0_i32_0 : i32, i32
  }
  func.func @transform_6(%arg0: i32) -> (i32, i32) {
    %c0_i32 = arith.constant 0 : i32
    %c0_i32_0 = arith.constant 0 : i32
    %c0_i32_1 = arith.constant 0 : i32
    return %c0_i32, %c0_i32_0 : i32, i32
  }
  func.func @transform_7(%arg0: i32) -> (i32, i32, i32) {
    %c0_i32 = arith.constant 0 : i32
    %c0_i32_0 = arith.constant 0 : i32
    %c0_i32_1 = arith.constant 0 : i32
    %c0_i32_2 = arith.constant 0 : i32
    return %c0_i32, %c0_i32_0, %c0_i32_1 : i32, i32, i32
  }
}

</mosaic_0001>

<bundles_post_ra>
// kernel: tile.18
= control target key start
LH: loop header
LB: loop body
LE: loop exit
PB: predicated region body
PF: predicated region fallthrough
CT: control target
= control target key end

     0   :  { %s28_s0 = inlined_call_operand.vmem [shape: f32[8], index: 0, kind: input, shape index: {}]   ;;  %s29_s1 = inlined_call_operand.vmem [shape: f32[16,8], index: 1, kind: output, shape index: {}]  }
   0x1   :  { %v4_v0 = vld [vmem:[%s28_s0] ss:$0 sm:$0xff] }
   0x2   :  { %5 = vst [vmem:[%s29_s1] sm:$0xff] %v4_v0  ;;  %8 = vst [vmem:[%s29_s1 + $0x8] sm:$0xff] %v4_v0 }

// kernel: tile.19
= control target key start
LH: loop header
LB: loop body
LE: loop exit
PB: predicated region body
PF: predicated region fallthrough
CT: control target
= control target key end

     0   :  { %s133_s10 = smov 120   ;;  %s134_s11 = smov 104   ;;  %vm3_vm0 = vcmask 64512   ;;  %vm9_vm1 = vcmask 1048512   ;;  %vm15_vm2 = vcmask 982912   ;;  %vm21_vm3 = vcmask 917312   ;;  %s209_s0 = inlined_call_operand.vmem [shape: f32[16,8], index: 0, kind: input, shape index: {}]   ;;  %s210_s1 = inlined_call_operand.vmem [shape: f32[1,128], index: 1, kind: output, shape index: {}]  }
   0x1   :  { %v103_v0 = vld [vmem:[%s209_s0 + $0xf] sm:$0x1]   ;;  %v105_v1 = vld [vmem:[%s209_s0 + $0xd] sm:$0x1]   ;;  %v104_v2 = vld [vmem:[%s209_s0 + $0xe] sm:$0x1]  }
   0x2   :  { %7 = vrot.lane.b32.xlu0 %v103_v0, %s133_s10  ;;  %19 = vrot.lane.b32.xlu1 %v105_v1, %s134_s11  ;;  %v106_v3 = vld [vmem:[%s209_s0 + $0xc] sm:$0x1]   ;;  %s135_s16 = smov 112   ;;  %s136_s17 = smov 96   ;;  %v107_v4 = vld [vmem:[%s209_s0 + $0xb] sm:$0x1]  }
   0x3   :  { %v108_v5 = vld [vmem:[%s209_s0 + $0xa] sm:$0x1]   ;;  %v2_v6 = vld [vmem:[%s209_s0] sm:$0x1]   ;;  %s137_s24 = smov 88   ;;  %s138_s25 = smov 80  }
   0x4   :  { %4 = vst.msk [vmem:[#allocation0] sm:$0x1] %vm3_vm0, %v2_v6   ;;  %v109_v7 = vld [vmem:[%s209_s0 + $0x9] sm:$0x1]   ;;  %v110_v8 = vld [vmem:[%s209_s0 + $0x8] sm:$0x1]  }
   0x5   :  { %s139_s30 = smov 72   ;;  %s140_s2 = smov 64   ;;  %v111_v9 = vld [vmem:[%s209_s0 + $0x7] sm:$0x1]   ;;  %v112_v10 = vld [vmem:[%s209_s0 + $0x6] sm:$0x1]  }
   0x6   :  { %13 = vrot.lane.b32.xlu0 %v104_v2, %s135_s16  ;;  %25 = vrot.lane.b32.xlu1 %v106_v3, %s136_s17  ;;  %s141_s7 = smov 56   ;;  %s142_s8 = smov 48   ;;  %v113_v11 = vld [vmem:[%s209_s0 + $0x5] sm:$0x1]   ;;  %v114_v12 = vld [vmem:[%s209_s0 + $0x4] sm:$0x1]  }
   0x7   :  { %s143_s13 = smov 40   ;;  %s144_s14 = smov 32   ;;  %v115_v13 = vld [vmem:[%s209_s0 + $0x3] sm:$0x1]   ;;  %v116_v14 = vld [vmem:[%s209_s0 + $0x2] sm:$0x1]  }
   0x8   :  { %s145_s19 = smov 24   ;;  %s146_s20 = smov 16   ;;  %v117_v15 = vld [vmem:[%s209_s0 + $0x1] sm:$0x1]   ;;  %vm27_vm4 = vcmask 851712   ;;  %vm33_vm5 = vcmask 786112  }
   0x9   :  { %s147_s0 = smov 8   ;;  %vm39_vm6 = vcmask 720512   ;;  %vm45_vm7 = vcmask 654912   ;;  %vm51_vm8 = vcmask 589312   ;;  %vm57_vm9 = vcmask 523712  }
   0xa   :  { %31 = vrot.lane.b32.xlu0 %v107_v4, %s137_s24  ;;  %37 = vrot.lane.b32.xlu1 %v108_v5, %s138_s25  ;;  %vm63_vm10 = vcmask 458112   ;;  %vm69_vm11 = vcmask 392512   ;;  %vm75_vm12 = vcmask 326912   ;;  %vm81_vm13 = vcmask 261312  }
   0xb   :  { %vm87_vm14 = vcmask 195712   ;;  %vm93_vm15 = vcmask 130112  }
   0xe   :  { %43 = vrot.lane.b32.xlu0 %v109_v7, %s139_s30  ;;  %49 = vrot.lane.b32.xlu1 %v110_v8, %s140_s2 }
  0x12   :  { %55 = vrot.lane.b32.xlu0 %v111_v9, %s141_s7  ;;  %61 = vrot.lane.b32.xlu1 %v112_v10, %s142_s8 }
  0x16   :  { %67 = vrot.lane.b32.xlu0 %v113_v11, %s143_s13  ;;  %73 = vrot.lane.b32.xlu1 %v114_v12, %s144_s14 }
  0x1a   :  { %79 = vrot.lane.b32.xlu0 %v115_v13, %s145_s19  ;;  %85 = vrot.lane.b32.xlu1 %v116_v14, %s146_s20 }
  0x1e   :  { %91 = vrot.lane.b32.xlu0 %v117_v15, %s147_s0 }
  0x74   :  { %v8_v16 = vpop.permute.xlu0 %7   ;;  %v20_v17 = vpop.permute.xlu1 %19  }
  0x75   :  { %10 = vst.msk [vmem:[#allocation0] sm:$0x1] %vm9_vm1, %v8_v16  }
  0x78   :  { %v14_v18 = vpop.permute.xlu0 %13   ;;  %v26_v19 = vpop.permute.xlu1 %25  }
  0x79   :  { %16 = vst.msk [vmem:[#allocation0] sm:$0x1] %vm15_vm2, %v14_v18  }
  0x7a   :  { %22 = vst.msk [vmem:[#allocation0] sm:$0x1] %vm21_vm3, %v20_v17  }
  0x7b   :  { %28 = vst.msk [vmem:[#allocation0] sm:$0x1] %vm27_vm4, %v26_v19  }
  0x7c   :  { %v32_v20 = vpop.permute.xlu0 %31   ;;  %v38_v21 = vpop.permute.xlu1 %37  }
  0x7d   :  { %34 = vst.msk [vmem:[#allocation0] sm:$0x1] %vm33_vm5, %v32_v20  }
  0x7e   :  { %40 = vst.msk [vmem:[#allocation0] sm:$0x1] %vm39_vm6, %v38_v21  }
  0x80   :  { %v44_v22 = vpop.permute.xlu0 %43   ;;  %v50_v23 = vpop.permute.xlu1 %49  }
  0x81   :  { %46 = vst.msk [vmem:[#allocation0] sm:$0x1] %vm45_vm7, %v44_v22  }
  0x82   :  { %52 = vst.msk [vmem:[#allocation0] sm:$0x1] %vm51_vm8, %v50_v23  }
  0x84   :  { %v56_v24 = vpop.permute.xlu0 %55   ;;  %v62_v25 = vpop.permute.xlu1 %61  }
  0x85   :  { %58 = vst.msk [vmem:[#allocation0] sm:$0x1] %vm57_vm9, %v56_v24  }
  0x86   :  { %64 = vst.msk [vmem:[#allocation0] sm:$0x1] %vm63_vm10, %v62_v25  }
  0x88   :  { %v68_v26 = vpop.permute.xlu0 %67   ;;  %v74_v27 = vpop.permute.xlu1 %73  }
  0x89   :  { %70 = vst.msk [vmem:[#allocation0] sm:$0x1] %vm69_vm11, %v68_v26  }
  0x8a   :  { %76 = vst.msk [vmem:[#allocation0] sm:$0x1] %vm75_vm12, %v74_v27  }
  0x8c   :  { %v80_v28 = vpop.permute.xlu0 %79   ;;  %v86_v29 = vpop.permute.xlu1 %85  }
  0x8d   :  { %82 = vst.msk [vmem:[#allocation0] sm:$0x1] %vm81_vm13, %v80_v28  }
  0x8e   :  { %88 = vst.msk [vmem:[#allocation0] sm:$0x1] %vm87_vm14, %v86_v29  }
  0x90   :  { %v92_v30 = vpop.permute.xlu0 %91  }
  0x91   :  { %94 = vst.msk [vmem:[#allocation0] sm:$0x1] %vm93_vm15, %v92_v30  }
  0x98   :  { %v99_v31 = vld [vmem:[#allocation0] sm:$0x1] }
  0x99   :  { %102 = vst [vmem:[%s210_s1] sm:$0x1] %v99_v31 }

// kernel: sepconv_mixture_forward.1
= control target key start
LH: loop header
LB: loop body
LE: loop exit
PB: predicated region body
PF: predicated region fallthrough
CT: control target
= control target key end

     0   :  { %v2118_v3 = vmov 0.0   ;;  %vm70_vm0 = vcmask 1046528   ;;  %vm272_vm1 = vcmask 1045504   ;;  %vm393_vm2 = vcmask 1044480   ;;  %s2120_s26 = smov 16   ;;  %s2121_s27 = smov 32   ;;  %s2865_s1 = inlined_call_operand.vmem [shape: f32[5,128,128], index: 1, kind: input, shape index: {}]   ;;  %s2866_s0 = inlined_call_operand.vmem [shape: f32[2,16,128], index: 0, kind: input, shape index: {}]   ;;  %s2867_s4 = inlined_call_operand.vmem [shape: f32[5,128,128], index: 4, kind: input, shape index: {}]   ;;  %s2868_s2 = inlined_call_operand.vmem [shape: f32[1,128], index: 2, kind: input, shape index: {}]   ;;  %s2869_s3 = inlined_call_operand.vmem [shape: f32[1,128], index: 3, kind: input, shape index: {}]   ;;  %s2870_s5 = inlined_call_operand.vmem [shape: f32[1,128], index: 5, kind: input, shape index: {}]   ;;  %s2871_s6 = inlined_call_operand.vmem [shape: f32[1,128], index: 6, kind: input, shape index: {}]   ;;  %s2872_s7 = inlined_call_operand.vmem [shape: f32[2,16,128], index: 7, kind: output, shape index: {}]  }
   0x1   :  { %v1412_v0 = vld [vmem:[%s2865_s1 + $0xf8] sm:$0xff]  ;;  %v1411_v2 = vld [vmem:[%s2865_s1 + $0xf0] sm:$0xff]  ;;  %26 = vst [vmem:[#allocation2] sm:$0x3] %v2118_v3  ;;  %27 = vst [vmem:[#allocation2 + $0x18] sm:$0x3] %v2118_v3 }
   0x2   :  { %v63_v1 = vld [vmem:[%s2865_s1 + $0x78] sm:$0xff]  ;;  %28 = vst [vmem:[#allocation2 + $0x12] sm:$0x3] %v2118_v3  ;;  %29 = vst [vmem:[#allocation2 + $0x2a] sm:$0x3] %v2118_v3  ;;  %1729 = vmatprep.subr.mxu0 %v1412_v0  ;;  %v62_v4 = vld [vmem:[%s2865_s1 + $0x70] sm:$0xff] }
   0x3   :  { %1767 = vmatprep.subr.mxu1 %v63_v1  ;;  %1730 = vmatpush3.msra.mxu0 %v1412_v0  ;;  %v1410_v5 = vld [vmem:[%s2865_s1 + $0xe8] sm:$0xff]  ;;  %v1409_v7 = vld [vmem:[%s2865_s1 + $0xe0] sm:$0xff]  ;;  %v1408_v9 = vld [vmem:[%s2865_s1 + $0xd8] sm:$0xff]  ;;  %vm514_vm3 = vcmask 1043456   ;;  %vm657_vm4 = vcmask 1040384   ;;  %s2122_s30 = smov 64  }
   0x4   :  { %1768 = vmatpush3.msra.mxu1 %v63_v1  ;;  %v61_v6 = vld [vmem:[%s2865_s1 + $0x68] sm:$0xff]  ;;  %1731 = vmatprep.subr.mxu0 %v1411_v2  ;;  %v60_v8 = vld [vmem:[%s2865_s1 + $0x60] sm:$0xff]  ;;  %v59_v10 = vld [vmem:[%s2865_s1 + $0x58] sm:$0xff] }
   0x5   :  { %1769 = vmatprep.subr.mxu1 %v62_v4  ;;  %1732 = vmatpush3.msra.mxu0 %v1411_v2  ;;  %v1407_v11 = vld [vmem:[%s2865_s1 + $0xd0] sm:$0xff]  ;;  %v1406_v13 = vld [vmem:[%s2865_s1 + $0xc8] sm:$0xff]  ;;  %v30_v15 = vld [vmem:[%s2866_s0] sm:$0xff] }
   0x6   :  { %1770 = vmatpush3.msra.mxu1 %v62_v4  ;;  %1733 = vmatprep.subr.mxu0 %v1410_v5  ;;  %v58_v12 = vld [vmem:[%s2865_s1 + $0x50] sm:$0xff]  ;;  %v57_v14 = vld [vmem:[%s2865_s1 + $0x48] sm:$0xff]  ;;  %v34_v17 = vmax.f32 %v30_v15, 0.0  ;;  %v1405_v18 = vld [vmem:[%s2865_s1 + $0xc0] sm:$0xff] }
   0x7   :  { %1771 = vmatprep.subr.mxu1 %v61_v6  ;;  %1734 = vmatpush3.msra.mxu0 %v1410_v5  ;;  %v31_v16 = vld [vmem:[%s2866_s0 + $0x8] sm:$0xff]  ;;  %v56_v19 = vld [vmem:[%s2865_s1 + $0x40] sm:$0xff]  ;;  %v1404_v21 = vld [vmem:[%s2865_s1 + $0xb8] sm:$0xff] }
   0x8   :  { %1772 = vmatpush3.msra.mxu1 %v61_v6  ;;  %1735 = vmatprep.subr.mxu0 %v1409_v7  ;;  %v35_v20 = vmax.f32 %v31_v16, 0.0  ;;  %38 = vst [vmem:[#allocation2 + $0x2] sm:$0xff] %v34_v17  ;;  %v55_v22 = vld [vmem:[%s2865_s1 + $0x38] sm:$0xff]  ;;  %v1403_v23 = vld [vmem:[%s2865_s1 + $0xb0] sm:$0xff]  ;;  %v1402_v25 = vld [vmem:[%s2865_s1 + $0xa8] sm:$0xff] }
   0x9   :  { %1773 = vmatprep.subr.mxu1 %v60_v8  ;;  %1736 = vmatpush3.msra.mxu0 %v1409_v7  ;;  %v54_v24 = vld [vmem:[%s2865_s1 + $0x30] sm:$0xff]  ;;  %v53_v26 = vld [vmem:[%s2865_s1 + $0x28] sm:$0xff]  ;;  %v1401_v28 = vld [vmem:[%s2865_s1 + $0xa0] sm:$0xff] }
   0xa   :  { %1774 = vmatpush3.msra.mxu1 %v60_v8  ;;  %1737 = vmatprep.subr.mxu0 %v1408_v9  ;;  %39 = vst [vmem:[#allocation2 + $0xa] sm:$0xff] %v35_v20  ;;  %v32_v27 = vld [vmem:[%s2866_s0 + $0x10] sm:$0xff]  ;;  %v52_v29 = vld [vmem:[%s2865_s1 + $0x20] sm:$0xff]  ;;  %v33_v30 = vld [vmem:[%s2866_s0 + $0x18] sm:$0xff] }
   0xb   :  { %1775 = vmatprep.subr.mxu1 %v59_v10  ;;  %1738 = vmatpush3.msra.mxu0 %v1408_v9  ;;  %v36_v31 = vmax.f32 %v32_v27, 0.0  ;;  %v1400_v32 = vld [vmem:[%s2865_s1 + $0x98] sm:$0xff]  ;;  %v37_v33 = vmax.f32 %v33_v30, 0.0  ;;  %v1399_v37 = vld [vmem:[%s2865_s1 + $0x90] sm:$0xff]  ;;  %v1398_v42 = vld [vmem:[%s2865_s1 + $0x88] sm:$0xff] }
   0xc   :  { %1776 = vmatpush3.msra.mxu1 %v59_v10  ;;  %1739 = vmatprep.subr.mxu0 %v1407_v11  ;;  %v51_v34 = vld [vmem:[%s2865_s1 + $0x18] sm:$0xff]  ;;  %v50_v38 = vld [vmem:[%s2865_s1 + $0x10] sm:$0xff]  ;;  %v49_v43 = vld [vmem:[%s2865_s1 + $0x8] sm:$0xff] }
   0xd   :  { %1777 = vmatprep.subr.mxu1 %v58_v12  ;;  %1740 = vmatpush3.msra.mxu0 %v1407_v11  ;;  %40 = vst [vmem:[#allocation2 + $0x1a] sm:$0xff] %v36_v31  ;;  %41 = vst [vmem:[#allocation2 + $0x22] sm:$0xff] %v37_v33  ;;  %v1397_v45 = vld [vmem:[%s2865_s1 + $0x80] sm:$0xff]  ;;  %v1428_v49 = vld [vmem:[%s2865_s1 + $0x178] sm:$0xff] }
   0xe   :  { %1778 = vmatpush3.msra.mxu1 %v58_v12  ;;  %1741 = vmatprep.subr.mxu0 %v1406_v13  ;;  %v48_v46 = vld [vmem:[%s2865_s1] sm:$0xff]  ;;  %v1444_v50 = vld [vmem:[%s2865_s1 + $0x1f8] sm:$0xff]  ;;  %v1427_v51 = vld [vmem:[%s2865_s1 + $0x170] sm:$0xff] }
   0xf   :  { %1779 = vmatprep.subr.mxu1 %v57_v14  ;;  %1742 = vmatpush3.msra.mxu0 %v1406_v13  ;;  %v2253_v35 = vld [vmem:[#allocation2] sm:$0xff]  ;;  %v1443_v52 = vld [vmem:[%s2865_s1 + $0x1f0] sm:$0xff]  ;;  %v1426_v53 = vld [vmem:[%s2865_s1 + $0x168] sm:$0xff] }
  0x10   :  { %1780 = vmatpush3.msra.mxu1 %v57_v14  ;;  %1743 = vmatprep.subr.mxu0 %v1405_v18  ;;  %v71_v40 = vrot.slane %v2253_v35, 1  ;;  %v1442_v54 = vld [vmem:[%s2865_s1 + $0x1e8] sm:$0xff]  ;;  %v1425_v55 = vld [vmem:[%s2865_s1 + $0x160] sm:$0xff]  ;;  %v1424_v57 = vld [vmem:[%s2865_s1 + $0x158] sm:$0xff]  ;;  %v273_v20 = vrot.slane %v2253_v35, 2  ;;  %v394_v27 = vrot.slane %v2253_v35, 3 }
  0x11   :  { %1781 = vmatprep.subr.mxu1 %v56_v19  ;;  %1744 = vmatpush3.msra.mxu0 %v1405_v18  ;;  %v2255_v36 = vld [vmem:[#allocation2 + $0x8] sm:$0xff]  ;;  %v2263_v39 = vld [vmem:[#allocation2 + $0x10] sm:$0xf]  ;;  %v1441_v56 = vld [vmem:[%s2865_s1 + $0x1e0] sm:$0xff] }
  0x12   :  { %1782 = vmatpush3.msra.mxu1 %v56_v19  ;;  %1745 = vmatprep.subr.mxu0 %v1404_v21  ;;  %v72_v41 = vrot.slane %v2255_v36, 1  ;;  %v74_v44 = vrot.slane %v2263_v39, 1  ;;  %v1440_v58 = vld [vmem:[%s2865_s1 + $0x1d8] sm:$0xff]  ;;  %v1423_v59 = vld [vmem:[%s2865_s1 + $0x150] sm:$0xff]  ;;  %v1422_v61 = vld [vmem:[%s2865_s1 + $0x148] sm:$0xff]  ;;  %v397_v30 = vrot.slane %v2263_v39, 3 }
  0x13   :  { %1783 = vmatprep.subr.mxu1 %v55_v22  ;;  %1746 = vmatpush3.msra.mxu0 %v1404_v21  ;;  %v1439_v60 = vld [vmem:[%s2865_s1 + $0x1d0] sm:$0xff]  ;;  %v1438_v62 = vld [vmem:[%s2865_s1 + $0x1c8] sm:$0xff]  ;;  %v1421_v63 = vld [vmem:[%s2865_s1 + $0x140] sm:$0xff]  ;;  %v274_v21 = vrot.slane %v2255_v36, 2 }
  0x14   :  { %1784 = vmatpush3.msra.mxu1 %v55_v22  ;;  %1747 = vmatprep.subr.mxu0 %v1403_v23  ;;  %v73_v47 = vsel %vm70_vm0, %v71_v40, %v72_v41  ;;  %v75_v48 = vsel %vm70_vm0, %v72_v41, %v74_v44  ;;  %v1437_v0 = vld [vmem:[%s2865_s1 + $0x1c0] sm:$0xff]  ;;  %v1420_v1 = vld [vmem:[%s2865_s1 + $0x138] sm:$0xff]  ;;  %v1419_v5 = vld [vmem:[%s2865_s1 + $0x130] sm:$0xff] }
  0x15   :  { %1785 = vmatprep.subr.mxu1 %v54_v24  ;;  %1748 = vmatpush3.msra.mxu0 %v1403_v23  ;;  %v1436_v2 = vld [vmem:[%s2865_s1 + $0x1b8] sm:$0xff]  ;;  %v2340_v4 = vld [vmem:[#allocation2 + $0x20] sm:$0xff]  ;;  %v1435_v6 = vld [vmem:[%s2865_s1 + $0x1b0] sm:$0xff] }
  0x16   :  { %1786 = vmatpush3.msra.mxu1 %v54_v24  ;;  %1749 = vmatprep.subr.mxu0 %v1402_v25  ;;  %v2338_v3 = vld [vmem:[#allocation2 + $0x18] sm:$0xff]  ;;  %v1418_v7 = vld [vmem:[%s2865_s1 + $0x128] sm:$0xff]  ;;  %v77_v10 = vrot.slane %v2340_v4, 1  ;;  %v1417_v12 = vld [vmem:[%s2865_s1 + $0x120] sm:$0xff]  ;;  %v276_v24 = vrot.slane %v2263_v39, 2  ;;  %v279_v33 = vrot.slane %v2340_v4, 2 }
  0x17   :  { %1787 = vmatprep.subr.mxu1 %v53_v26  ;;  %1750 = vmatpush3.msra.mxu0 %v1402_v25  ;;  %v1434_v8 = vld [vmem:[%s2865_s1 + $0x1a8] sm:$0xff]  ;;  %v76_v9 = vrot.slane %v2338_v3, 1  ;;  %v1433_v13 = vld [vmem:[%s2865_s1 + $0x1a0] sm:$0xff]  ;;  %v1416_v15 = vld [vmem:[%s2865_s1 + $0x118] sm:$0xff]  ;;  %v400_v40 = vrot.slane %v2340_v4, 3 }
  0x18   :  { %1788 = vmatpush3.msra.mxu1 %v53_v26  ;;  %1751 = vmatprep.subr.mxu0 %v1401_v28  ;;  %v2356_v11 = vld [vmem:[#allocation2 + $0x28] sm:$0xf]  ;;  %v1415_v17 = vld [vmem:[%s2865_s1 + $0x110] sm:$0xff]  ;;  %v1432_v18 = vld [vmem:[%s2865_s1 + $0x198] sm:$0xff]  ;;  %v277_v31 = vsel %vm272_vm1, %v274_v21, %v276_v24 }
  0x19   :  { %1789 = vmatprep.subr.mxu1 %v52_v29  ;;  %1752 = vmatpush3.msra.mxu0 %v1401_v28  ;;  %v79_v14 = vrot.slane %v2356_v11, 1  ;;  %v78_v16 = vsel %vm70_vm0, %v76_v9, %v77_v10  ;;  %v1414_v22 = vld [vmem:[%s2865_s1 + $0x108] sm:$0xff]  ;;  %v1431_v23 = vld [vmem:[%s2865_s1 + $0x190] sm:$0xff]  ;;  %v1413_v25 = vld [vmem:[%s2865_s1 + $0x100] sm:$0xff]  ;;  %v395_v28 = vrot.slane %v2255_v36, 3  ;;  %v402_v44 = vrot.slane %v2356_v11, 3 }
  0x1a   :  { %1790 = vmatpush3.msra.mxu1 %v52_v29  ;;  %1753 = vmatprep.subr.mxu0 %v1400_v32  ;;  %v1430_v26 = vld [vmem:[%s2865_s1 + $0x188] sm:$0xff]  ;;  %v275_v29 = vsel %vm272_vm1, %v273_v20, %v274_v21 }
  0x1b   :  { %1791 = vmatprep.subr.mxu1 %v51_v34  ;;  %1754 = vmatpush3.msra.mxu0 %v1400_v32  ;;  %v80_v19 = vsel %vm70_vm0, %v77_v10, %v79_v14  ;;  %v278_v32 = vrot.slane %v2338_v3, 2  ;;  %v396_v41 = vsel %vm393_vm2, %v394_v27, %v395_v28 }
  0x1c   :  { %1792 = vmatpush3.msra.mxu1 %v51_v34  ;;  %1755 = vmatprep.subr.mxu0 %v1399_v37  ;;  %v1429_v34 = vld [vmem:[%s2865_s1 + $0x180] sm:$0xff] }
  0x1d   :  { %1793 = vmatprep.subr.mxu1 %v50_v38  ;;  %1756 = vmatpush3.msra.mxu0 %v1399_v37  ;;  %v1460_v37 = vld [vmem:[%s2865_s1 + $0x278] sm:$0xff] }
  0x1e   :  { %1794 = vmatpush3.msra.mxu1 %v50_v38  ;;  %1757 = vmatprep.subr.mxu0 %v1398_v42  ;;  %v399_v38 = vrot.slane %v2338_v3, 3 }
  0x1f   :  { %1795 = vmatprep.subr.mxu1 %v49_v43  ;;  %1758 = vmatpush3.msra.mxu0 %v1398_v42  ;;  %v281_v42 = vrot.slane %v2356_v11, 2 }
  0x20   :  { %1796 = vmatpush3.msra.mxu1 %v49_v43  ;;  %1759 = vmatprep.subr.mxu0 %v1397_v45  ;;  %v398_v43 = vsel %vm393_vm2, %v395_v28, %v397_v30 }
  0x21   :  { %1797 = vmatprep.subr.mxu1 %v48_v46  ;;  %1760 = vmatpush3.msra.mxu0 %v1397_v45  ;;  %v1459_v45 = vld [vmem:[%s2865_s1 + $0x270] sm:$0xff] }
  0x22   :  { %1761 = vmatprep.mubr.f32.mxu0 %v73_v47  ;;  %1798 = vmatpush3.msra.mxu1 %v48_v46  ;;  %v280_v46 = vsel %vm272_vm1, %v278_v32, %v279_v33  ;;  %v515_v47 = vrot.slane %v2253_v35, 4 }
  0x23   :  { %1799 = vmatprep.mubr.f32.mxu1 %v2253_v35  ;;  %1762 = vmatmul.mubr.f32.vlgmr.msra.gmra.mxu0 %v75_v48  ;;  %v516_v48 = vrot.slane %v2255_v36, 4  ;;  %v1457_v35 = vld [vmem:[%s2865_s1 + $0x260] sm:$0xff] }
  0x24   :  { %1800 = vmatmul.mubr.f32.vlgmr.msra.gmra.mxu1 %v2255_v36  ;;  %1805 = vmatprep.subr.mxu0 %v1428_v49 }
  0x25   :  { %1843 = vmatprep.subr.mxu1 %v1444_v50  ;;  %1806 = vmatpush3.msra.mxu0 %v1428_v49  ;;  %v401_v49 = vsel %vm393_vm2, %v399_v38, %v400_v40  ;;  %v517_v36 = vsel %vm514_vm3, %v515_v47, %v516_v48 }
  0x26   :  { %1844 = vmatpush3.msra.mxu1 %v1444_v50  ;;  %1807 = vmatprep.subr.mxu0 %v1427_v51  ;;  %v282_v50 = vsel %vm272_vm1, %v279_v33, %v281_v42 }
  0x27   :  { %1845 = vmatprep.subr.mxu1 %v1443_v52  ;;  %1808 = vmatpush3.msra.mxu0 %v1427_v51  ;;  %v1458_v51 = vld [vmem:[%s2865_s1 + $0x268] sm:$0xff] }
  0x28   :  { %1846 = vmatpush3.msra.mxu1 %v1443_v52  ;;  %1809 = vmatprep.subr.mxu0 %v1426_v53  ;;  %v403_v52 = vsel %vm393_vm2, %v400_v40, %v402_v44 }
  0x29   :  { %1847 = vmatprep.subr.mxu1 %v1442_v54  ;;  %1810 = vmatpush3.msra.mxu0 %v1426_v53  ;;  %v1456_v53 = vld [vmem:[%s2865_s1 + $0x258] sm:$0xff] }
  0x2a   :  { %1848 = vmatpush3.msra.mxu1 %v1442_v54  ;;  %1811 = vmatprep.subr.mxu0 %v1425_v55  ;;  %v1455_v54 = vld [vmem:[%s2865_s1 + $0x250] sm:$0xff] }
  0x2b   :  { %1849 = vmatprep.subr.mxu1 %v1441_v56  ;;  %1812 = vmatpush3.msra.mxu0 %v1425_v55  ;;  %v1454_v55 = vld [vmem:[%s2865_s1 + $0x248] sm:$0xff] }
  0x2c   :  { %1850 = vmatpush3.msra.mxu1 %v1441_v56  ;;  %1813 = vmatprep.subr.mxu0 %v1424_v57  ;;  %v1453_v56 = vld [vmem:[%s2865_s1 + $0x240] sm:$0xff] }
  0x2d   :  { %1851 = vmatprep.subr.mxu1 %v1440_v58  ;;  %1814 = vmatpush3.msra.mxu0 %v1424_v57  ;;  %v1452_v57 = vld [vmem:[%s2865_s1 + $0x238] sm:$0xff] }
  0x2e   :  { %1852 = vmatpush3.msra.mxu1 %v1440_v58  ;;  %1815 = vmatprep.subr.mxu0 %v1423_v59  ;;  %v1451_v58 = vld [vmem:[%s2865_s1 + $0x230] sm:$0xff] }
  0x2f   :  { %1853 = vmatprep.subr.mxu1 %v1439_v60  ;;  %1816 = vmatpush3.msra.mxu0 %v1423_v59  ;;  %v1450_v59 = vld [vmem:[%s2865_s1 + $0x228] sm:$0xff] }
  0x30   :  { %1854 = vmatpush3.msra.mxu1 %v1439_v60  ;;  %1817 = vmatprep.subr.mxu0 %v1422_v61  ;;  %v1449_v60 = vld [vmem:[%s2865_s1 + $0x220] sm:$0xff] }
  0x31   :  { %1855 = vmatprep.subr.mxu1 %v1438_v62  ;;  %1818 = vmatpush3.msra.mxu0 %v1422_v61  ;;  %v1448_v61 = vld [vmem:[%s2865_s1 + $0x218] sm:$0xff] }
  0x32   :  { %1856 = vmatpush3.msra.mxu1 %v1438_v62  ;;  %1819 = vmatprep.subr.mxu0 %v1421_v63  ;;  %v1447_v62 = vld [vmem:[%s2865_s1 + $0x210] sm:$0xff] }
  0x33   :  { %1857 = vmatprep.subr.mxu1 %v1437_v0  ;;  %1820 = vmatpush3.msra.mxu0 %v1421_v63  ;;  %v1446_v63 = vld [vmem:[%s2865_s1 + $0x208] sm:$0xff] }
  0x34   :  { %1858 = vmatpush3.msra.mxu1 %v1437_v0  ;;  %1821 = vmatprep.subr.mxu0 %v1420_v1  ;;  %v518_v0 = vrot.slane %v2263_v39, 4 }
  0x35   :  { %1859 = vmatprep.subr.mxu1 %v1436_v2  ;;  %1822 = vmatpush3.msra.mxu0 %v1420_v1  ;;  %v520_v1 = vrot.slane %v2338_v3, 4 }
  0x36   :  { %1860 = vmatpush3.msra.mxu1 %v1436_v2  ;;  %1823 = vmatprep.subr.mxu0 %v1419_v5  ;;  %v521_v2 = vrot.slane %v2340_v4, 4 }
  0x37   :  { %1861 = vmatprep.subr.mxu1 %v1435_v6  ;;  %1824 = vmatpush3.msra.mxu0 %v1419_v5  ;;  %v1445_v5 = vld [vmem:[%s2865_s1 + $0x200] sm:$0xff]  ;;  %s2119_s1 = smov 8  }
  0x38   :  { %1862 = vmatpush3.msra.mxu1 %v1435_v6  ;;  %1825 = vmatprep.subr.mxu0 %v1418_v7  ;;  %v519_v6 = vsel %vm514_vm3, %v516_v48, %v518_v0 }
  0x39   :  { %1863 = vmatprep.subr.mxu1 %v1434_v8  ;;  %1826 = vmatpush3.msra.mxu0 %v1418_v7  ;;  %v523_v7 = vrot.slane %v2356_v11, 4 }
  0x3a   :  { %1864 = vmatpush3.msra.mxu1 %v1434_v8  ;;  %1827 = vmatprep.subr.mxu0 %v1417_v12  ;;  %v522_v8 = vsel %vm514_vm3, %v520_v1, %v521_v2 }
  0x3b   :  { %1865 = vmatprep.subr.mxu1 %v1433_v13  ;;  %1828 = vmatpush3.msra.mxu0 %v1417_v12  ;;  %v524_v39 = vsel %vm514_vm3, %v521_v2, %v523_v7 }
  0x3c   :  { %1866 = vmatpush3.msra.mxu1 %v1433_v13  ;;  %1829 = vmatprep.subr.mxu0 %v1416_v15 }
  0x3d   :  { %1764 = vmatprep.mubr.f32.mxu0 %v78_v16  ;;  %1830 = vmatpush3.msra.mxu0 %v1416_v15 }
  0x3e   :  { %1802 = vmatprep.mubr.f32.mxu1 %v2338_v3  ;;  %1831 = vmatprep.subr.mxu0 %v1415_v17 }
  0x3f   :  { %1867 = vmatprep.subr.mxu1 %v1432_v18  ;;  %1765 = vmatmul.mubr.f32.gmra.mxu0 %v80_v19 }
  0x40   :  { %1803 = vmatmul.mubr.f32.gmra.mxu1 %v2340_v4  ;;  %1832 = vmatpush3.msra.mxu0 %v1415_v17 }
  0x41   :  { %1868 = vmatpush3.msra.mxu1 %v1432_v18  ;;  %1833 = vmatprep.subr.mxu0 %v1414_v22 }
  0x42   :  { %1869 = vmatprep.subr.mxu1 %v1431_v23  ;;  %1834 = vmatpush3.msra.mxu0 %v1414_v22 }
  0x43   :  { %1870 = vmatpush3.msra.mxu1 %v1431_v23  ;;  %1835 = vmatprep.subr.mxu0 %v1413_v25 }
  0x44   :  { %1871 = vmatprep.subr.mxu1 %v1430_v26  ;;  %1836 = vmatpush3.msra.mxu0 %v1413_v25 }
  0x45   :  { %1837 = vmatprep.mubr.f32.mxu0 %v275_v29  ;;  %1872 = vmatpush3.msra.mxu1 %v1430_v26 }
  0x46   :  { %1838 = vmatmul.mubr.f32.vlgmr.msra.gmra.mxu0 %v277_v31  ;;  %1873 = vmatprep.subr.mxu1 %v1429_v34 }
  0x47   :  { %1881 = vmatprep.subr.mxu0 %v1460_v37  ;;  %1874 = vmatpush3.msra.mxu1 %v1429_v34 }
  0x48   :  { %1875 = vmatprep.mubr.f32.mxu1 %v396_v41  ;;  %1882 = vmatpush3.msra.mxu0 %v1460_v37 }
  0x49   :  { %1876 = vmatmul.mubr.f32.vlgmr.msra.gmra.mxu1 %v398_v43  ;;  %1883 = vmatprep.subr.mxu0 %v1459_v45 }
  0x4a   :  { %1840 = vmatprep.mubr.f32.mxu0 %v280_v46  ;;  %1884 = vmatpush3.msra.mxu0 %v1459_v45 }
  0x4b   :  { %1878 = vmatprep.mubr.f32.mxu1 %v401_v49  ;;  %1841 = vmatmul.mubr.f32.gmra.mxu0 %v282_v50 }
  0x4c   :  { %1885 = vmatprep.subr.mxu0 %v1458_v51  ;;  %1913 = vmatprep.mubr.f32.mxu0 %v517_v36 }
  0x4d   :  { %1886 = vmatpush3.msra.mxu0 %v1458_v51  ;;  %1879 = vmatmul.mubr.f32.gmra.mxu1 %v403_v52 }
  0x4e   :  { %1887 = vmatprep.subr.mxu0 %v1457_v35 }
  0x4f   :  { %1888 = vmatpush3.msra.mxu0 %v1457_v35 }
  0x50   :  { %1889 = vmatprep.subr.mxu0 %v1456_v53 }
  0x51   :  { %1890 = vmatpush3.msra.mxu0 %v1456_v53 }
  0x52   :  { %1891 = vmatprep.subr.mxu0 %v1455_v54 }
  0x53   :  { %1892 = vmatpush3.msra.mxu0 %v1455_v54 }
  0x54   :  { %1893 = vmatprep.subr.mxu0 %v1454_v55 }
  0x55   :  { %1894 = vmatpush3.msra.mxu0 %v1454_v55 }
  0x56   :  { %1895 = vmatprep.subr.mxu0 %v1453_v56 }
  0x57   :  { %1896 = vmatpush3.msra.mxu0 %v1453_v56 }
  0x58   :  { %1897 = vmatprep.subr.mxu0 %v1452_v57 }
  0x59   :  { %1898 = vmatpush3.msra.mxu0 %v1452_v57 }
  0x5a   :  { %1899 = vmatprep.subr.mxu0 %v1451_v58 }
  0x5b   :  { %1900 = vmatpush3.msra.mxu0 %v1451_v58 }
  0x5c   :  { %1901 = vmatprep.subr.mxu0 %v1450_v59 }
  0x5d   :  { %1902 = vmatpush3.msra.mxu0 %v1450_v59 }
  0x5e   :  { %1903 = vmatprep.subr.mxu0 %v1449_v60 }
  0x5f   :  { %1904 = vmatpush3.msra.mxu0 %v1449_v60 }
  0x60   :  { %1905 = vmatprep.subr.mxu0 %v1448_v61 }
  0x61   :  { %1906 = vmatpush3.msra.mxu0 %v1448_v61 }
  0x62   :  { %1907 = vmatprep.subr.mxu0 %v1447_v62 }
  0x63   :  { %1908 = vmatpush3.msra.mxu0 %v1447_v62 }
  0x64   :  { %1909 = vmatprep.subr.mxu0 %v1446_v63 }
  0x65   :  { %1910 = vmatpush3.msra.mxu0 %v1446_v63 }
  0x66   :  { %1911 = vmatprep.subr.mxu0 %v1445_v5 }
  0x67   :  { %1912 = vmatpush3.msra.mxu0 %v1445_v5 }
  0x68   :  { %1914 = vmatmul.mubr.f32.vlgmr.msra.gmra.mxu0 %v519_v6 }
  0x69   :  { %1916 = vmatprep.mubr.f32.mxu0 %v522_v8 }
  0x6c   :  { %1917 = vmatmul.mubr.f32.gmra.mxu0 %v524_v39 }
  0xe3   :  { %v1763_v3 = vpop.f32.mrf.mxu0 }
  0xe4   :  { %v1801_v9 = vpop.f32.mrf.mxu1 }
  0xe5   :  { %v168_v4 = vpop.f32.mrf.mxu0  ;;  %v259_v20 = vadd.f32 %v1801_v9, %v1763_v3  ;;  %v742_v9 = vld [vmem:[%s2867_s4 + $0x70] sm:$0xff] }
  0xe6   :  { %v253_v12 = vpop.f32.mrf.mxu1 }
  0xe7   :  { %v254_v21 = vadd.f32 %v253_v12, %v168_v4  ;;  %v743_v4 = vld [vmem:[%s2867_s4 + $0x78] sm:$0xff]  ;;  %v741_v12 = vld [vmem:[%s2867_s4 + $0x68] sm:$0xff] }
  0xe8   :  { %1957 = vmatprep.subr.mxu0 %v743_v4 }
  0xe9   :  { %1958 = vmatpush3.msra.mxu0 %v743_v4 }
  0xea   :  { %1959 = vmatprep.subr.mxu0 %v742_v9 }
  0xeb   :  { %1960 = vmatpush3.msra.mxu0 %v742_v9 }
  0xec   :  { %1961 = vmatprep.subr.mxu0 %v741_v12 }
  0xed   :  { %1962 = vmatpush3.msra.mxu0 %v741_v12 }
  0xff   :  { %v1766_v10 = vpop.f32.mrf.mxu0 }
 0x100   :  { %v1804_v14 = vpop.f32.mrf.mxu1 }
 0x101   :  { %v178_v13 = vpop.f32.mrf.mxu0  ;;  %v269_v26 = vadd.f32 %v1804_v14, %v1766_v10  ;;  %v1478_v10 = vld [vmem:[%s2867_s4 + $0xf8] sm:$0xff]  ;;  %v740_v14 = vld [vmem:[%s2867_s4 + $0x60] sm:$0xff] }
 0x102   :  { %v263_v16 = vpop.f32.mrf.mxu1  ;;  %1919 = vmatprep.subr.mxu1 %v1478_v10  ;;  %1963 = vmatprep.subr.mxu0 %v740_v14 }
 0x103   :  { %v264_v27 = vadd.f32 %v263_v16, %v178_v13  ;;  %1920 = vmatpush3.msra.mxu1 %v1478_v10  ;;  %v1477_v13 = vld [vmem:[%s2867_s4 + $0xf0] sm:$0xff]  ;;  %1964 = vmatpush3.msra.mxu0 %v740_v14  ;;  %v739_v16 = vld [vmem:[%s2867_s4 + $0x58] sm:$0xff] }
 0x104   :  { %1921 = vmatprep.subr.mxu1 %v1477_v13  ;;  %1965 = vmatprep.subr.mxu0 %v739_v16 }
 0x105   :  { %1922 = vmatpush3.msra.mxu1 %v1477_v13  ;;  %1966 = vmatpush3.msra.mxu0 %v739_v16 }
 0x106   :  { %v1839_v15 = vpop.f32.mrf.mxu0 }
 0x107   :  { %v390_v22 = vadd.f32 %v1839_v15, %v259_v20  ;;  %v1476_v15 = vld [vmem:[%s2867_s4 + $0xe8] sm:$0xff]  ;;  %v1473_v20 = vld [vmem:[%s2867_s4 + $0xd0] sm:$0xff] }
 0x108   :  { %v370_v17 = vpop.f32.mrf.mxu0  ;;  %1923 = vmatprep.subr.mxu1 %v1476_v15 }
 0x109   :  { %v1877_v11 = vpop.f32.mrf.mxu1  ;;  %v389_v23 = vadd.f32 %v370_v17, %v254_v21  ;;  %1924 = vmatpush3.msra.mxu1 %v1476_v15  ;;  %v1475_v17 = vld [vmem:[%s2867_s4 + $0xe0] sm:$0xff]  ;;  %v1509_v15 = vld [vmem:[%s2867_s4 + $0x1f0] sm:$0xff] }
 0x10a   :  { %v511_v29 = vadd.f32 %v1877_v11, %v390_v22  ;;  %1925 = vmatprep.subr.mxu1 %v1475_v17  ;;  %v738_v11 = vld [vmem:[%s2867_s4 + $0x50] sm:$0xff]  ;;  %v736_v21 = vld [vmem:[%s2867_s4 + $0x40] sm:$0xff]  ;;  %v1472_v22 = vld [vmem:[%s2867_s4 + $0xc8] sm:$0xff] }
 0x10b   :  { %v1842_v18 = vpop.f32.mrf.mxu0  ;;  %v491_v19 = vpop.f32.mrf.mxu1  ;;  %1926 = vmatpush3.msra.mxu1 %v1475_v17  ;;  %1967 = vmatprep.subr.mxu0 %v738_v11 }
 0x10c   :  { %v392_v30 = vadd.f32 %v1842_v18, %v269_v26  ;;  %v510_v31 = vadd.f32 %v491_v19, %v389_v23  ;;  %v1474_v18 = vld [vmem:[%s2867_s4 + $0xd8] sm:$0xff]  ;;  %1968 = vmatpush3.msra.mxu0 %v738_v11  ;;  %v737_v19 = vld [vmem:[%s2867_s4 + $0x48] sm:$0xff] }
 0x10d   :  { %v380_v24 = vpop.f32.mrf.mxu0  ;;  %v1880_v25 = vpop.f32.mrf.mxu1  ;;  %1927 = vmatprep.subr.mxu1 %v1474_v18  ;;  %1969 = vmatprep.subr.mxu0 %v737_v19  ;;  %v735_v23 = vld [vmem:[%s2867_s4 + $0x38] sm:$0xff] }
 0x10e   :  { %v391_v32 = vadd.f32 %v380_v24, %v264_v27  ;;  %v513_v41 = vadd.f32 %v1880_v25, %v392_v30  ;;  %1928 = vmatpush3.msra.mxu1 %v1474_v18  ;;  %1970 = vmatpush3.msra.mxu0 %v737_v19  ;;  %v1471_v24 = vld [vmem:[%s2867_s4 + $0xc0] sm:$0xff]  ;;  %v734_v25 = vld [vmem:[%s2867_s4 + $0x30] sm:$0xff]  ;;  %v1470_v26 = vld [vmem:[%s2867_s4 + $0xb8] sm:$0xff] }
 0x10f   :  { %v501_v33 = vpop.f32.mrf.mxu1  ;;  %1929 = vmatprep.subr.mxu1 %v1473_v20  ;;  %1971 = vmatprep.subr.mxu0 %v736_v21  ;;  %v733_v27 = vld [vmem:[%s2867_s4 + $0x28] sm:$0xff] }
 0x110   :  { %v512_v42 = vadd.f32 %v501_v33, %v391_v32  ;;  %1930 = vmatpush3.msra.mxu1 %v1473_v20  ;;  %1972 = vmatpush3.msra.mxu0 %v736_v21  ;;  %v1468_v30 = vld [vmem:[%s2867_s4 + $0xa8] sm:$0xff]  ;;  %v1467_v32 = vld [vmem:[%s2867_s4 + $0xa0] sm:$0xff]  ;;  %v730_v33 = vld [vmem:[%s2867_s4 + $0x10] sm:$0xff] }
 0x111   :  { %1931 = vmatprep.subr.mxu1 %v1472_v22  ;;  %1973 = vmatprep.subr.mxu0 %v735_v23 }
 0x112   :  { %1932 = vmatpush3.msra.mxu1 %v1472_v22  ;;  %1974 = vmatpush3.msra.mxu0 %v735_v23  ;;  %v1508_v23 = vld [vmem:[%s2867_s4 + $0x1e8] sm:$0xff] }
 0x113   :  { %1933 = vmatprep.subr.mxu1 %v1471_v24  ;;  %1975 = vmatprep.subr.mxu0 %v734_v25 }
 0x114   :  { %1934 = vmatpush3.msra.mxu1 %v1471_v24  ;;  %1976 = vmatpush3.msra.mxu0 %v734_v25 }
 0x115   :  { %1935 = vmatprep.subr.mxu1 %v1470_v26  ;;  %1977 = vmatprep.subr.mxu0 %v733_v27 }
 0x116   :  { %1936 = vmatpush3.msra.mxu1 %v1470_v26  ;;  %1978 = vmatpush3.msra.mxu0 %v733_v27  ;;  %v1493_v26 = vld [vmem:[%s2867_s4 + $0x170] sm:$0xff] }
 0x128   :  { %v1915_v28 = vpop.f32.mrf.mxu0 }
 0x129   :  { %v2471_v37 = vadd.f32 %v1915_v28, %v511_v29  ;;  %v1469_v28 = vld [vmem:[%s2867_s4 + $0xb0] sm:$0xff]  ;;  %v732_v29 = vld [vmem:[%s2867_s4 + $0x20] sm:$0xff] }
 0x12a   :  { %v612_v34 = vpop.f32.mrf.mxu0  ;;  %1937 = vmatprep.subr.mxu1 %v1469_v28  ;;  %1979 = vmatprep.subr.mxu0 %v732_v29 }
 0x12b   :  { %v2473_v38 = vadd.f32 %v612_v34, %v510_v31  ;;  %v645_v45 = vmul.f32 %v2471_v37, %v2471_v37  ;;  %1938 = vmatpush3.msra.mxu1 %v1469_v28  ;;  %1980 = vmatpush3.msra.mxu0 %v732_v29  ;;  %v731_v31 = vld [vmem:[%s2867_s4 + $0x18] sm:$0xff] }
 0x12c   :  { %v1918_v40 = vpop.f32.mrf.mxu0  ;;  %1939 = vmatprep.subr.mxu1 %v1468_v30  ;;  %1981 = vmatprep.subr.mxu0 %v731_v31  ;;  %v1466_v34 = vld [vmem:[%s2867_s4 + $0x98] sm:$0xff] }
 0x12d   :  { %v644_v43 = vmul.f32 %v2473_v38, %v2473_v38  ;;  %v635_v46 = vadd.f32 %v2471_v37, %v2473_v38  ;;  %v2481_v47 = vadd.f32 %v1918_v40, %v513_v41  ;;  %1940 = vmatpush3.msra.mxu1 %v1468_v30  ;;  %1982 = vmatpush3.msra.mxu0 %v731_v31  ;;  %v729_v40 = vld [vmem:[%s2867_s4 + $0x8] sm:$0xff]  ;;  %v1465_v41 = vld [vmem:[%s2867_s4 + $0x90] sm:$0xff]  ;;  %v1507_v30 = vld [vmem:[%s2867_s4 + $0x1e0] sm:$0xff] }
 0x12e   :  { %v622_v44 = vpop.f32.mrf.mxu0  ;;  %1941 = vmatprep.subr.mxu1 %v1467_v32  ;;  %1983 = vmatprep.subr.mxu0 %v730_v33 }
 0x12f   :  { %v2483_v48 = vadd.f32 %v622_v44, %v512_v42  ;;  %v648_v49 = vadd.f32 %v645_v45, %v644_v43  ;;  %v647_v52 = vmul.f32 %v2481_v47, %v2481_v47  ;;  %1942 = vmatpush3.msra.mxu1 %v1467_v32  ;;  %1984 = vmatpush3.msra.mxu0 %v730_v33  ;;  %v728_v42 = vld [vmem:[%s2867_s4] sm:$0xff]  ;;  %v1464_v43 = vld [vmem:[%s2867_s4 + $0x88] sm:$0xff]  ;;  %v1510_v44 = vld [vmem:[%s2867_s4 + $0x1f8] sm:$0xff] }
 0x130   :  { %1943 = vmatprep.subr.mxu1 %v1466_v34  ;;  %1985 = vmatprep.subr.mxu0 %v729_v40  ;;  %v1463_v45 = vld [vmem:[%s2867_s4 + $0x80] sm:$0xff]  ;;  %v1492_v32 = vld [vmem:[%s2867_s4 + $0x168] sm:$0xff] }
 0x131   :  { %v636_v50 = vadd.f32 %v635_v46, %v2483_v48  ;;  %v646_v51 = vmul.f32 %v2483_v48, %v2483_v48  ;;  %1944 = vmatpush3.msra.mxu1 %v1466_v34  ;;  %1986 = vmatpush3.msra.mxu0 %v729_v40  ;;  %v2601_v46 = vld [vmem:[%s2867_s4 + $0x178] sm:$0xff] }
 0x132   :  { %1945 = vmatprep.subr.mxu1 %v1465_v41  ;;  %1987 = vmatprep.subr.mxu0 %v728_v42 }
 0x133   :  { %v637_v35 = vadd.f32 %v636_v50, %v2481_v47  ;;  %v649_v36 = vadd.f32 %v648_v49, %v646_v51  ;;  %1946 = vmatpush3.msra.mxu1 %v1465_v41  ;;  %1988 = vmatpush3.msra.mxu0 %v728_v42  ;;  %v1506_v41 = vld [vmem:[%s2867_s4 + $0x1d8] sm:$0xff] }
 0x134   :  { %1947 = vmatprep.subr.mxu1 %v1464_v43  ;;  %2033 = vmatprep.subr.mxu0 %v1510_v44 }
 0x135   :  { %v638_v53 = vrot.slane %v637_v35, 4  ;;  %v650_v54 = vadd.f32 %v649_v36, %v647_v52  ;;  %1948 = vmatpush3.msra.mxu1 %v1464_v43 }
 0x136   :  { %1949 = vmatprep.subr.mxu1 %v1463_v45 }
 0x137   :  { %v639_v55 = vadd.f32 %v638_v53, %v637_v35  ;;  %v651_v56 = vrot.slane %v650_v54, 4  ;;  %1950 = vmatpush3.msra.mxu1 %v1463_v45  ;;  %v1491_v45 = vld [vmem:[%s2867_s4 + $0x160] sm:$0xff] }
 0x138   :  { %1995 = vmatprep.subr.mxu1 %v2601_v46 }
 0x139   :  { %v640_v57 = vrot.slane %v639_v55, 2  ;;  %v652_v58 = vadd.f32 %v651_v56, %v650_v54  ;;  %v687_v54 = vlaneseq }
 0x13b   :  { %v641_v59 = vadd.f32 %v640_v57, %v639_v55  ;;  %v653_v60 = vrot.slane %v652_v58, 2  ;;  %v2605_v55 = vshrl.u32 %v687_v54, 7  ;;  %v1461_v57 = vld [vmem:[%s2868_s2] ss:$0 sm:$0xff] }
 0x13c   :  { %v1503_v54 = vld [vmem:[%s2867_s4 + $0x1c0] sm:$0xff] }
 0x13d   :  { %v642_v61 = vrot.slane %v641_v59, 1  ;;  %v654_v62 = vadd.f32 %v653_v60, %v652_v58  ;;  %v689_v56 = vsub.s32 0, %v2605_v55 }
 0x13f   :  { %v655_v63 = vrot.slane %v654_v62, 1  ;;  %v643_v0 = vadd.f32 %v642_v61, %v641_v59  ;;  %v697_v59 = vsub.s32 1, %v2605_v55 }
 0x141   :  { %v656_v1 = vadd.f32 %v655_v63, %v654_v62 }
 0x143   :  { %v658_v2 = vsel %vm657_vm4, %v643_v0, %v656_v1 }
 0x144   :  { %659 = vrot.lane.b32.xlu0 %v658_v2, %s2119_s1 }
 0x1b6   :  { %v660_v5 = vpop.permute.xlu0 %659 }
 0x1b7   :  { %v661_v6 = vadd.f32 %v660_v5, %v658_v2  ;;  %v1462_v5 = vld [vmem:[%s2869_s3] ss:$0 sm:$0xff] }
 0x1b9   :  { %662 = vrot.lane.b32.xlu0 %v661_v6, %s2120_s26 }
 0x22b   :  { %v663_v7 = vpop.permute.xlu0 %662 }
 0x22c   :  { %v664_v8 = vadd.f32 %v663_v7, %v661_v6 }
 0x22e   :  { %665 = vrot.lane.b32.xlu1 %v664_v8, %s2121_s27 }
 0x2a0   :  { %v666_v39 = vpop.permute.xlu1 %665 }
 0x2a1   :  { %v2495_v3 = vadd.f32 %v666_v39, %v664_v8 }
 0x2a3   :  { %668 = vrot.lane.b32.xlu1 %v2495_v3, %s2122_s30 }
 0x315   :  { %v669_v49 = vpop.permute.xlu1 %668 }
 0x316   :  { %v670_v50 = vadd.f32 %v669_v49, %v2495_v3 }
 0x318   :  { %v671_v51 = vmul.f32 0.001953125, %v670_v50 }
 0x31a   :  { %v672_v52 = vmul.f32 %v671_v51, %v671_v51  ;;  %v690_v58 = vrot.slane %v671_v51, %v689_v56 }
 0x31c   :  { %v674_v35 = vrot.slane %v672_v52, 7  ;;  %v691_v62 = vsub.f32 %v2473_v38, %v690_v58  ;;  %v692_v63 = vsub.f32 %v2471_v37, %v690_v58  ;;  %v693_v0 = vsub.f32 %v2483_v48, %v690_v58  ;;  %v1490_v52 = vld [vmem:[%s2867_s4 + $0x158] sm:$0xff] }
 0x31d   :  { %v694_v1 = vsub.f32 %v2481_v47, %v690_v58  ;;  %v1502_v58 = vld [vmem:[%s2867_s4 + $0x1b8] sm:$0xff] }
 0x31e   :  { %v676_v36 = vsub.f32 %v671_v51, %v674_v35  ;;  %v1505_v51 = vld [vmem:[%s2867_s4 + $0x1d0] sm:$0xff] }
 0x320   :  { %v677_v53 = vadd.f32 1e-05, %v676_v36  ;;  %v1504_v36 = vld [vmem:[%s2867_s4 + $0x1c8] sm:$0xff] }
 0x322   :  { %2114 = vrsqrt.f32 %v677_v53  ;;  %v1489_v53 = vld [vmem:[%s2867_s4 + $0x150] sm:$0xff] }
 0x32f   :  { %v2115_v60 = vpop.eup %2114 }
 0x330   :  { %v686_v61 = vmul.f32 %v2115_v60, %v1461_v57  ;;  %v1488_v57 = vld [vmem:[%s2867_s4 + $0x148] sm:$0xff]  ;;  %v1487_v60 = vld [vmem:[%s2867_s4 + $0x140] sm:$0xff] }
 0x332   :  { %v698_v2 = vrot.slane %v686_v61, %v697_v59  ;;  %v1501_v61 = vld [vmem:[%s2867_s4 + $0x1b0] sm:$0xff] }
 0x334   :  { %v699_v6 = vmul.f32 %v698_v2, %v691_v62  ;;  %v700_v7 = vmul.f32 %v698_v2, %v692_v63  ;;  %v701_v8 = vmul.f32 %v698_v2, %v693_v0  ;;  %v702_v39 = vmul.f32 %v698_v2, %v694_v1  ;;  %v1486_v62 = vld [vmem:[%s2867_s4 + $0x138] sm:$0xff]  ;;  %v1500_v63 = vld [vmem:[%s2867_s4 + $0x1a8] sm:$0xff]  ;;  %v1485_v0 = vld [vmem:[%s2867_s4 + $0x130] sm:$0xff] }
 0x335   :  { %v1499_v1 = vld [vmem:[%s2867_s4 + $0x1a0] sm:$0xff]  ;;  %v1484_v2 = vld [vmem:[%s2867_s4 + $0x128] sm:$0xff] }
 0x336   :  { %v710_v3 = vadd.f32 %v1462_v5, %v699_v6  ;;  %v711_v4 = vadd.f32 %v1462_v5, %v700_v7  ;;  %v712_v38 = vadd.f32 %v1462_v5, %v701_v8  ;;  %v713_v9 = vadd.f32 %v1462_v5, %v702_v39  ;;  %v1498_v5 = vld [vmem:[%s2867_s4 + $0x198] sm:$0xff]  ;;  %v1483_v6 = vld [vmem:[%s2867_s4 + $0x120] sm:$0xff]  ;;  %v1497_v7 = vld [vmem:[%s2867_s4 + $0x190] sm:$0xff] }
 0x337   :  { %v1482_v8 = vld [vmem:[%s2867_s4 + $0x118] sm:$0xff]  ;;  %v1496_v39 = vld [vmem:[%s2867_s4 + $0x188] sm:$0xff] }
 0x338   :  { %v714_v37 = vmax.f32 %v710_v3, 0.0  ;;  %v715_v10 = vmax.f32 %v711_v4, 0.0  ;;  %v716_v48 = vmax.f32 %v712_v38, 0.0  ;;  %v717_v12 = vmax.f32 %v713_v9, 0.0  ;;  %v1481_v3 = vld [vmem:[%s2867_s4 + $0x110] sm:$0xff]  ;;  %v1495_v4 = vld [vmem:[%s2867_s4 + $0x180] sm:$0xff] }
 0x339   :  { %v1480_v38 = vld [vmem:[%s2867_s4 + $0x108] sm:$0xff] }
 0x33a   :  { %718 = vst [vmem:[#allocation2 + $0x2] sm:$0xff] %v714_v37  ;;  %719 = vst [vmem:[#allocation2 + $0xa] sm:$0xff] %v715_v10 }
 0x33b   :  { %720 = vst [vmem:[#allocation2 + $0x1a] sm:$0xff] %v716_v48  ;;  %721 = vst [vmem:[#allocation2 + $0x22] sm:$0xff] %v717_v12  ;;  %v1479_v48 = vld [vmem:[%s2867_s4 + $0x100] sm:$0xff] }
 0x341   :  { %v2623_v47 = vld [vmem:[#allocation2] sm:$0xff]  ;;  %v2625_v13 = vld [vmem:[#allocation2 + $0x8] sm:$0xff]  ;;  %v2635_v11 = vld [vmem:[#allocation2 + $0x10] sm:$0xf] }
 0x342   :  { %v2627_v14 = vld [vmem:[#allocation2 + $0x18] sm:$0xff]  ;;  %1989 = vmatprep.mubr.f32.mxu0 %v2623_v47  ;;  %v750_v16 = vrot.slane %v2623_v47, 1  ;;  %v751_v17 = vrot.slane %v2625_v13, 1  ;;  %v2637_v18 = vld [vmem:[#allocation2 + $0x20] sm:$0xff]  ;;  %v753_v19 = vrot.slane %v2635_v11, 1  ;;  %v1071_v27 = vrot.slane %v2623_v47, 3 }
 0x343   :  { %1990 = vmatmul.mubr.f32.vlgmr.msra.gmra.mxu0 %v2625_v13  ;;  %v755_v20 = vrot.slane %v2627_v14, 1  ;;  %v756_v21 = vrot.slane %v2637_v18, 1  ;;  %v2648_v24 = vld [vmem:[#allocation2 + $0x28] sm:$0xf]  ;;  %v1072_v28 = vrot.slane %v2625_v13, 3  ;;  %v951_v33 = vrot.slane %v2623_v47, 2 }
 0x344   :  { %2034 = vmatpush3.msra.mxu0 %v1510_v44  ;;  %1992 = vmatprep.mubr.f32.mxu0 %v2627_v14  ;;  %v752_v22 = vsel %vm70_vm0, %v750_v16, %v751_v17  ;;  %v754_v25 = vsel %vm70_vm0, %v751_v17, %v753_v19  ;;  %v758_v31 = vrot.slane %v2648_v24, 1  ;;  %v952_v34 = vrot.slane %v2625_v13, 2  ;;  %v1526_v19 = vld [vmem:[%s2867_s4 + $0x278] sm:$0xff] }
 0x345   :  { %2035 = vmatprep.subr.mxu0 %v1509_v15  ;;  %1951 = vmatprep.mubr.f32.mxu1 %v752_v22  ;;  %v757_v29 = vsel %vm70_vm0, %v755_v20, %v756_v21  ;;  %v1073_v40 = vsel %vm393_vm2, %v1071_v27, %v1072_v28  ;;  %v1196_v42 = vrot.slane %v2627_v14, 4  ;;  %v1197_v43 = vrot.slane %v2637_v18, 4 }
 0x346   :  { %2036 = vmatpush3.msra.mxu0 %v1509_v15  ;;  %1952 = vmatmul.mubr.f32.vlgmr.msra.gmra.mxu1 %v754_v25  ;;  %v759_v44 = vsel %vm70_vm0, %v756_v21, %v758_v31  ;;  %v953_v50 = vsel %vm272_vm1, %v951_v33, %v952_v34  ;;  %v1074_v9 = vrot.slane %v2635_v11, 3  ;;  %v1076_v37 = vrot.slane %v2627_v14, 3  ;;  %v1520_v31 = vld [vmem:[%s2867_s4 + $0x248] sm:$0xff]  ;;  %v1518_v33 = vld [vmem:[%s2867_s4 + $0x238] sm:$0xff] }
 0x347   :  { %1996 = vmatpush3.msra.mxu1 %v2601_v46  ;;  %2037 = vmatprep.subr.mxu0 %v1508_v23  ;;  %v1199_v46 = vrot.slane %v2648_v24, 4  ;;  %v2682_v49 = vsel %vm514_vm3, %v1196_v42, %v1197_v43  ;;  %v1077_v10 = vrot.slane %v2637_v18, 3  ;;  %v954_v12 = vrot.slane %v2635_v11, 2  ;;  %v1514_v42 = vld [vmem:[%s2867_s4 + $0x218] sm:$0xff] }
 0x348   :  { %1954 = vmatprep.mubr.f32.mxu1 %v757_v29  ;;  %1993 = vmatmul.mubr.f32.gmra.mxu0 %v2637_v18  ;;  %v956_v15 = vrot.slane %v2627_v14, 2  ;;  %v957_v16 = vrot.slane %v2637_v18, 2  ;;  %v1075_v17 = vsel %vm393_vm2, %v1072_v28, %v1074_v9  ;;  %v1079_v20 = vrot.slane %v2648_v24, 3  ;;  %v1525_v18 = vld [vmem:[%s2867_s4 + $0x270] sm:$0xff]  ;;  %v1524_v28 = vld [vmem:[%s2867_s4 + $0x268] sm:$0xff]  ;;  %v1523_v29 = vld [vmem:[%s2867_s4 + $0x260] sm:$0xff] }
 0x349   :  { %1997 = vmatprep.subr.mxu1 %v1493_v26  ;;  %2038 = vmatpush3.msra.mxu0 %v1508_v23  ;;  %v2694_v35 = vsel %vm514_vm3, %v1197_v43, %v1199_v46  ;;  %v1078_v21 = vsel %vm393_vm2, %v1076_v37, %v1077_v10  ;;  %v955_v14 = vsel %vm272_vm1, %v952_v34, %v954_v12  ;;  %v959_v22 = vrot.slane %v2648_v24, 2  ;;  %v1517_v34 = vld [vmem:[%s2867_s4 + $0x230] sm:$0xff] }
 0x34a   :  { %1998 = vmatpush3.msra.mxu1 %v1493_v26  ;;  %2039 = vmatprep.subr.mxu0 %v1507_v30  ;;  %v958_v23 = vsel %vm272_vm1, %v956_v15, %v957_v16  ;;  %v1191_v25 = vrot.slane %v2623_v47, 4  ;;  %v1192_v26 = vrot.slane %v2625_v13, 4  ;;  %v1080_v27 = vsel %vm393_vm2, %v1077_v10, %v1079_v20  ;;  %v1522_v13 = vld [vmem:[%s2867_s4 + $0x258] sm:$0xff]  ;;  %v1513_v43 = vld [vmem:[%s2867_s4 + $0x210] sm:$0xff] }
 0x34b   :  { %2065 = vmatprep.mubr.f32.mxu0 %v1073_v40  ;;  %1999 = vmatprep.subr.mxu1 %v1492_v32  ;;  %v960_v24 = vsel %vm272_vm1, %v957_v16, %v959_v22  ;;  %v1516_v40 = vld [vmem:[%s2867_s4 + $0x228] sm:$0xff]  ;;  %v1194_v46 = vrot.slane %v2635_v11, 4 }
 0x34c   :  { %2040 = vmatpush3.msra.mxu0 %v1507_v30  ;;  %1955 = vmatmul.mubr.f32.gmra.mxu1 %v759_v44  ;;  %v1193_v47 = vsel %vm514_vm3, %v1191_v25, %v1192_v26  ;;  %v1521_v30 = vld [vmem:[%s2867_s4 + $0x250] sm:$0xff]  ;;  %v1512_v44 = vld [vmem:[%s2867_s4 + $0x208] sm:$0xff] }
 0x34d   :  { %2000 = vmatpush3.msra.mxu1 %v1492_v32  ;;  %2041 = vmatprep.subr.mxu0 %v1506_v41  ;;  %v1519_v32 = vld [vmem:[%s2867_s4 + $0x240] sm:$0xff] }
 0x34e   :  { %2001 = vmatprep.subr.mxu1 %v1491_v45  ;;  %2027 = vmatprep.mubr.f32.mxu1 %v953_v50  ;;  %v1195_v50 = vsel %vm514_vm3, %v1192_v26, %v1194_v46 }
 0x34f   :  { %2042 = vmatpush3.msra.mxu0 %v1506_v41  ;;  %2002 = vmatpush3.msra.mxu1 %v1491_v45  ;;  %v1515_v41 = vld [vmem:[%s2867_s4 + $0x220] sm:$0xff] }
 0x350   :  { %2043 = vmatprep.subr.mxu0 %v1505_v51  ;;  %2003 = vmatprep.subr.mxu1 %v1490_v52  ;;  %v1511_v45 = vld [vmem:[%s2867_s4 + $0x200] sm:$0xff] }
 0x351   :  { %2044 = vmatpush3.msra.mxu0 %v1505_v51  ;;  %2004 = vmatpush3.msra.mxu1 %v1490_v52 }
 0x352   :  { %2045 = vmatprep.subr.mxu0 %v1504_v36  ;;  %2005 = vmatprep.subr.mxu1 %v1489_v53 }
 0x353   :  { %2046 = vmatpush3.msra.mxu0 %v1504_v36  ;;  %2006 = vmatpush3.msra.mxu1 %v1489_v53 }
 0x354   :  { %2047 = vmatprep.subr.mxu0 %v1503_v54  ;;  %2007 = vmatprep.subr.mxu1 %v1488_v57 }
 0x355   :  { %2048 = vmatpush3.msra.mxu0 %v1503_v54  ;;  %2008 = vmatpush3.msra.mxu1 %v1488_v57 }
 0x356   :  { %2049 = vmatprep.subr.mxu0 %v1502_v58  ;;  %2009 = vmatprep.subr.mxu1 %v1487_v60 }
 0x357   :  { %2050 = vmatpush3.msra.mxu0 %v1502_v58  ;;  %2010 = vmatpush3.msra.mxu1 %v1487_v60 }
 0x358   :  { %2051 = vmatprep.subr.mxu0 %v1501_v61  ;;  %2011 = vmatprep.subr.mxu1 %v1486_v62 }
 0x359   :  { %2052 = vmatpush3.msra.mxu0 %v1501_v61  ;;  %2012 = vmatpush3.msra.mxu1 %v1486_v62 }
 0x35a   :  { %2053 = vmatprep.subr.mxu0 %v1500_v63  ;;  %2013 = vmatprep.subr.mxu1 %v1485_v0 }
 0x35b   :  { %2054 = vmatpush3.msra.mxu0 %v1500_v63  ;;  %2014 = vmatpush3.msra.mxu1 %v1485_v0 }
 0x35c   :  { %2055 = vmatprep.subr.mxu0 %v1499_v1  ;;  %2015 = vmatprep.subr.mxu1 %v1484_v2 }
 0x35d   :  { %2056 = vmatpush3.msra.mxu0 %v1499_v1  ;;  %2016 = vmatpush3.msra.mxu1 %v1484_v2 }
 0x35e   :  { %2057 = vmatprep.subr.mxu0 %v1498_v5  ;;  %2017 = vmatprep.subr.mxu1 %v1483_v6 }
 0x35f   :  { %2058 = vmatpush3.msra.mxu0 %v1498_v5  ;;  %2018 = vmatpush3.msra.mxu1 %v1483_v6 }
 0x360   :  { %2059 = vmatprep.subr.mxu0 %v1497_v7  ;;  %2019 = vmatprep.subr.mxu1 %v1482_v8 }
 0x361   :  { %2060 = vmatpush3.msra.mxu0 %v1497_v7  ;;  %2020 = vmatpush3.msra.mxu1 %v1482_v8 }
 0x362   :  { %2061 = vmatprep.subr.mxu0 %v1496_v39  ;;  %2021 = vmatprep.subr.mxu1 %v1481_v3 }
 0x363   :  { %2062 = vmatpush3.msra.mxu0 %v1496_v39  ;;  %2022 = vmatpush3.msra.mxu1 %v1481_v3 }
 0x364   :  { %2063 = vmatprep.subr.mxu0 %v1495_v4  ;;  %2023 = vmatprep.subr.mxu1 %v1480_v38 }
 0x365   :  { %2064 = vmatpush3.msra.mxu0 %v1495_v4  ;;  %2024 = vmatpush3.msra.mxu1 %v1480_v38 }
 0x366   :  { %2066 = vmatmul.mubr.f32.vlgmr.msra.gmra.mxu0 %v1075_v17  ;;  %2025 = vmatprep.subr.mxu1 %v1479_v48 }
 0x367   :  { %2068 = vmatprep.mubr.f32.mxu0 %v1078_v21  ;;  %2026 = vmatpush3.msra.mxu1 %v1479_v48 }
 0x368   :  { %2028 = vmatmul.mubr.f32.vlgmr.msra.gmra.mxu1 %v955_v14  ;;  %2071 = vmatprep.subr.mxu1 %v1526_v19 }
 0x369   :  { %2030 = vmatprep.mubr.f32.mxu1 %v958_v23  ;;  %2072 = vmatpush3.msra.mxu1 %v1526_v19 }
 0x36a   :  { %2069 = vmatmul.mubr.f32.gmra.mxu0 %v1080_v27  ;;  %2073 = vmatprep.subr.mxu1 %v1525_v18 }
 0x36b   :  { %2074 = vmatpush3.msra.mxu1 %v1525_v18 }
 0x36c   :  { %2031 = vmatmul.mubr.f32.gmra.mxu1 %v960_v24  ;;  %2075 = vmatprep.subr.mxu1 %v1524_v28 }
 0x36d   :  { %2076 = vmatpush3.msra.mxu1 %v1524_v28  ;;  %2103 = vmatprep.mubr.f32.mxu1 %v1193_v47 }
 0x36e   :  { %2077 = vmatprep.subr.mxu1 %v1523_v29 }
 0x36f   :  { %2078 = vmatpush3.msra.mxu1 %v1523_v29 }
 0x370   :  { %2079 = vmatprep.subr.mxu1 %v1522_v13 }
 0x371   :  { %2080 = vmatpush3.msra.mxu1 %v1522_v13 }
 0x372   :  { %2081 = vmatprep.subr.mxu1 %v1521_v30 }
 0x373   :  { %2082 = vmatpush3.msra.mxu1 %v1521_v30 }
 0x374   :  { %2083 = vmatprep.subr.mxu1 %v1520_v31 }
 0x375   :  { %2084 = vmatpush3.msra.mxu1 %v1520_v31 }
 0x376   :  { %2085 = vmatprep.subr.mxu1 %v1519_v32 }
 0x377   :  { %2086 = vmatpush3.msra.mxu1 %v1519_v32 }
 0x378   :  { %2087 = vmatprep.subr.mxu1 %v1518_v33 }
 0x379   :  { %2088 = vmatpush3.msra.mxu1 %v1518_v33 }
 0x37a   :  { %2089 = vmatprep.subr.mxu1 %v1517_v34 }
 0x37b   :  { %2090 = vmatpush3.msra.mxu1 %v1517_v34 }
 0x37c   :  { %2091 = vmatprep.subr.mxu1 %v1516_v40 }
 0x37d   :  { %2092 = vmatpush3.msra.mxu1 %v1516_v40 }
 0x37e   :  { %2093 = vmatprep.subr.mxu1 %v1515_v41 }
 0x37f   :  { %2094 = vmatpush3.msra.mxu1 %v1515_v41 }
 0x380   :  { %2095 = vmatprep.subr.mxu1 %v1514_v42 }
 0x381   :  { %2096 = vmatpush3.msra.mxu1 %v1514_v42 }
 0x382   :  { %2097 = vmatprep.subr.mxu1 %v1513_v43 }
 0x383   :  { %2098 = vmatpush3.msra.mxu1 %v1513_v43 }
 0x384   :  { %2099 = vmatprep.subr.mxu1 %v1512_v44 }
 0x385   :  { %2100 = vmatpush3.msra.mxu1 %v1512_v44 }
 0x386   :  { %2101 = vmatprep.subr.mxu1 %v1511_v45 }
 0x387   :  { %2102 = vmatpush3.msra.mxu1 %v1511_v45 }
 0x388   :  { %2104 = vmatmul.mubr.f32.vlgmr.msra.gmra.mxu1 %v1195_v50 }
 0x389   :  { %2106 = vmatprep.mubr.f32.mxu1 %v2682_v49 }
 0x38c   :  { %2107 = vmatmul.mubr.f32.gmra.mxu1 %v2694_v35 }
 0x403   :  { %v1991_v36 = vpop.f32.mrf.mxu0 }
 0x405   :  { %v932_v54 = vpop.f32.mrf.mxu0 }
 0x406   :  { %v1953_v51 = vpop.f32.mrf.mxu1 }
 0x407   :  { %v938_v0 = vadd.f32 %v1991_v36, %v1953_v51 }
 0x408   :  { %v847_v52 = vpop.f32.mrf.mxu1  ;;  %v1994_v58 = vpop.f32.mrf.mxu0 }
 0x409   :  { %v933_v1 = vadd.f32 %v932_v54, %v847_v52 }
 0x40a   :  { %v942_v11 = vpop.f32.mrf.mxu0 }
 0x40c   :  { %v1956_v53 = vpop.f32.mrf.mxu1 }
 0x40d   :  { %v948_v7 = vadd.f32 %v1994_v58, %v1956_v53 }
 0x40e   :  { %v857_v57 = vpop.f32.mrf.mxu1 }
 0x40f   :  { %v943_v35 = vadd.f32 %v942_v11, %v857_v57 }
 0x426   :  { %v2067_v62 = vpop.f32.mrf.mxu0 }
 0x428   :  { %v2029_v60 = vpop.f32.mrf.mxu1  ;;  %v1168_v2 = vpop.f32.mrf.mxu0 }
 0x429   :  { %v1068_v5 = vadd.f32 %v2029_v60, %v938_v0 }
 0x42a   :  { %v1048_v61 = vpop.f32.mrf.mxu1  ;;  %v2070_v8 = vpop.f32.mrf.mxu0 }
 0x42b   :  { %v1067_v6 = vadd.f32 %v1048_v61, %v933_v1  ;;  %v1188_v38 = vadd.f32 %v2067_v62, %v1068_v5 }
 0x42c   :  { %v2032_v63 = vpop.f32.mrf.mxu1  ;;  %v1178_v12 = vpop.f32.mrf.mxu0 }
 0x42d   :  { %v1070_v3 = vadd.f32 %v2032_v63, %v948_v7  ;;  %v1187_v9 = vadd.f32 %v1168_v2, %v1067_v6  ;;  %v1527_v63 = vld [vmem:[%s2870_s5] ss:$0 sm:$0xff] }
 0x42e   :  { %v1058_v49 = vpop.f32.mrf.mxu1 }
 0x42f   :  { %v1069_v4 = vadd.f32 %v1058_v49, %v943_v35  ;;  %v1190_v17 = vadd.f32 %v2070_v8, %v1070_v3  ;;  %v1528_v8 = vld [vmem:[%s2871_s6] ss:$0 sm:$0xff] }
 0x431   :  { %v1189_v19 = vadd.f32 %v1178_v12, %v1069_v4 }
 0x448   :  { %v2105_v39 = vpop.f32.mrf.mxu1 }
 0x449   :  { %v2832_v10 = vadd.f32 %v2105_v39, %v1188_v38 }
 0x44a   :  { %v1288_v37 = vpop.f32.mrf.mxu1 }
 0x44b   :  { %v1307_v48 = vadd.f32 %v1288_v37, %v1187_v9  ;;  %v1321_v21 = vmul.f32 %v2832_v10, %v2832_v10 }
 0x44c   :  { %v2108_v15 = vpop.f32.mrf.mxu1 }
 0x44d   :  { %v1320_v16 = vmul.f32 %v1307_v48, %v1307_v48  ;;  %v1311_v14 = vadd.f32 %v2832_v10, %v1307_v48  ;;  %v1310_v18 = vadd.f32 %v2108_v15, %v1190_v17 }
 0x44e   :  { %v1298_v20 = vpop.f32.mrf.mxu1 }
 0x44f   :  { %v1309_v22 = vadd.f32 %v1298_v20, %v1189_v19  ;;  %v1324_v23 = vadd.f32 %v1321_v21, %v1320_v16  ;;  %v1323_v27 = vmul.f32 %v1310_v18, %v1310_v18 }
 0x451   :  { %v1312_v25 = vadd.f32 %v1311_v14, %v1309_v22  ;;  %v1322_v26 = vmul.f32 %v1309_v22, %v1309_v22 }
 0x453   :  { %v1313_v28 = vadd.f32 %v1312_v25, %v1310_v18  ;;  %v1325_v24 = vadd.f32 %v1324_v23, %v1322_v26 }
 0x455   :  { %v1314_v29 = vrot.slane %v1313_v28, 4  ;;  %v1326_v47 = vadd.f32 %v1325_v24, %v1323_v27 }
 0x457   :  { %v1315_v13 = vadd.f32 %v1314_v29, %v1313_v28  ;;  %v1327_v30 = vrot.slane %v1326_v47, 4 }
 0x459   :  { %v1316_v31 = vrot.slane %v1315_v13, 2  ;;  %v1328_v32 = vadd.f32 %v1327_v30, %v1326_v47 }
 0x45b   :  { %v1317_v33 = vadd.f32 %v1316_v31, %v1315_v13  ;;  %v1329_v34 = vrot.slane %v1328_v32, 2 }
 0x45d   :  { %v1318_v40 = vrot.slane %v1317_v33, 1  ;;  %v1330_v41 = vadd.f32 %v1329_v34, %v1328_v32 }
 0x45f   :  { %v1331_v42 = vrot.slane %v1330_v41, 1  ;;  %v1319_v43 = vadd.f32 %v1318_v40, %v1317_v33 }
 0x461   :  { %v1332_v44 = vadd.f32 %v1331_v42, %v1330_v41 }
 0x463   :  { %v1333_v45 = vsel %vm657_vm4, %v1319_v43, %v1332_v44 }
 0x464   :  { %1334 = vrot.lane.b32.xlu0 %v1333_v45, %s2119_s1 }
 0x4d6   :  { %v1335_v46 = vpop.permute.xlu0 %1334 }
 0x4d7   :  { %v1336_v50 = vadd.f32 %v1335_v46, %v1333_v45 }
 0x4d9   :  { %1337 = vrot.lane.b32.xlu1 %v1336_v50, %s2120_s26 }
 0x54b   :  { %v1338_v51 = vpop.permute.xlu1 %1337 }
 0x54c   :  { %v1339_v52 = vadd.f32 %v1338_v51, %v1336_v50 }
 0x54e   :  { %1340 = vrot.lane.b32.xlu0 %v1339_v52, %s2121_s27 }
 0x5c0   :  { %v1341_v36 = vpop.permute.xlu0 %1340 }
 0x5c1   :  { %v1342_v53 = vadd.f32 %v1341_v36, %v1339_v52 }
 0x5c3   :  { %1343 = vrot.lane.b32.xlu1 %v1342_v53, %s2122_s30 }
 0x635   :  { %v1344_v54 = vpop.permute.xlu1 %1343 }
 0x636   :  { %v1345_v57 = vadd.f32 %v1344_v54, %v1342_v53 }
 0x638   :  { %v1346_v58 = vmul.f32 0.001953125, %v1345_v57 }
 0x63a   :  { %v1347_v60 = vmul.f32 %v1346_v58, %v1346_v58  ;;  %v1365_v0 = vrot.slane %v1346_v58, %v689_v56 }
 0x63c   :  { %v1349_v11 = vrot.slane %v1347_v60, 7  ;;  %v1366_v5 = vsub.f32 %v1307_v48, %v1365_v0  ;;  %v1367_v6 = vsub.f32 %v2832_v10, %v1365_v0  ;;  %v1368_v49 = vsub.f32 %v1309_v22, %v1365_v0 }
 0x63d   :  { %v1369_v7 = vsub.f32 %v1310_v18, %v1365_v0 }
 0x63e   :  { %v1351_v61 = vsub.f32 %v1346_v58, %v1349_v11 }
 0x640   :  { %v1352_v62 = vadd.f32 1e-05, %v1351_v61 }
 0x642   :  { %2116 = vrsqrt.f32 %v1352_v62 }
 0x64f   :  { %v2117_v1 = vpop.eup %2116 }
 0x650   :  { %v1361_v2 = vmul.f32 %v2117_v1, %v1527_v63 }
 0x652   :  { %v1373_v35 = vrot.slane %v1361_v2, %v697_v59 }
 0x654   :  { %v1374_v39 = vmul.f32 %v1373_v35, %v1366_v5  ;;  %v1375_v3 = vmul.f32 %v1373_v35, %v1367_v6  ;;  %v1376_v4 = vmul.f32 %v1373_v35, %v1368_v49  ;;  %v1377_v38 = vmul.f32 %v1373_v35, %v1369_v7 }
 0x656   :  { %v1385_v9 = vadd.f32 %v1528_v8, %v1374_v39  ;;  %v1386_v56 = vadd.f32 %v1528_v8, %v1375_v3  ;;  %v1387_v37 = vadd.f32 %v1528_v8, %v1376_v4  ;;  %v1388_v12 = vadd.f32 %v1528_v8, %v1377_v38 }
 0x658   :  { %1389 = vst [vmem:[%s2872_s7] sm:$0xff] %v1385_v9  ;;  %1390 = vst [vmem:[%s2872_s7 + $0x8] sm:$0xff] %v1386_v56 }
 0x659   :  { %1391 = vst [vmem:[%s2872_s7 + $0x10] sm:$0xff] %v1387_v37  ;;  %1392 = vst [vmem:[%s2872_s7 + $0x18] sm:$0xff] %v1388_v12 }

</bundles_post_ra>
